<compile_context>
chip_gen: v7x
topology: tpu7x:2x2x1
jax: 0.10.0
libtpu: 0.0.40
codegen_flags: <defaults>
</compile_context>

<pallas_src>
import functools

import jax
import jax.numpy as jnp
from jax.experimental import pallas as pl
from jax.experimental.pallas import tpu as pltpu

_LN_EPS = 1e-5  # torch.nn.LayerNorm default eps


def _round_up(n, m):
    return ((n + m - 1) // m) * m


def _tensorcores_per_chip():
    # Only chips with 2 TensorCores benefit from forcing >=2 "parallel" grid steps;
    # on single-TC chips (v5e/v6e) the grid is a serial loop and splitting only adds
    # per-step overhead.
    try:
        kind = jax.devices()[0].device_kind.lower()
    except Exception:
        return 1
    return 2 if any(t in kind for t in ("v7", "v4", "v5p")) else 1


# -----------------------------------------------------------------------------
# Kernel: operates on lane-packed rows (PACK batch rows per 128-lane vreg row).
# -----------------------------------------------------------------------------
def critic_kernel(x_ref, w1_ref, w2_ref, wo_ref, vec_ref, out_ref, *, seg_dim):
    f32 = jnp.float32
    hi = jax.lax.Precision.HIGHEST
    pack = out_ref.shape[-1]

    # Block-diagonal segment-mean matrix kron(I_pack, ones(D,D)/D), generated in
    # registers.  seg_dim divides 128 => power of two => cheap bit-mask compare.
    blk = ~(seg_dim - 1)
    r = jax.lax.broadcasted_iota(jnp.int32, (128, 128), 0)
    c = jax.lax.broadcasted_iota(jnp.int32, (128, 128), 1)
    seg = ((r & blk) == (c & blk)).astype(f32) * (1.0 / seg_dim)

    def seg_layernorm(h):
        # LayerNorm without affine (affines folded into the following Linear).
        # mean and E[h^2] are two back-to-back MXU pushes -> they pipeline.
        mean = jnp.dot(h, seg, preferred_element_type=f32, precision=hi)
        ex2 = jnp.dot(h * h, seg, preferred_element_type=f32, precision=hi)
        var = ex2 - mean * mean
        return (h - mean) * jax.lax.rsqrt(var + _LN_EPS)

    h = seg_layernorm(x_ref[...].astype(f32))                                   # feature_norm
    h = jnp.dot(h, w1_ref[...], preferred_element_type=f32, precision=hi) + vec_ref[0:1, :]
    h = seg_layernorm(jnp.maximum(h, 0.0))                                      # LN after block 1
    h = jnp.dot(h, w2_ref[...], preferred_element_type=f32, precision=hi) + vec_ref[1:2, :]
    h = seg_layernorm(jnp.maximum(h, 0.0))                                      # LN after block 2
    v = jnp.dot(h, wo_ref[...], preferred_element_type=f32, precision=hi) + vec_ref[2:3, 0:pack]
    out_ref[...] = v.astype(out_ref.dtype)


# -----------------------------------------------------------------------------
# Wrapper-side weight preparation (done once).
# -----------------------------------------------------------------------------
def pack_params(params):
    f32 = jnp.float32
    D, H = params["w1"].shape
    if D != H or 128 % D != 0:
        raise NotImplementedError(
            "packed kernel requires obs_dim == hidden_size and 128 % dim == 0")
    pack = 128 // D
    eye = jnp.eye(pack, dtype=f32)

    fn_w, fn_b = params["fn_w"].astype(f32), params["fn_b"].astype(f32)
    w1, b1 = params["w1"].astype(f32), params["b1"].astype(f32)
    g1, be1 = params["g1"].astype(f32), params["be1"].astype(f32)
    w2, b2 = params["w2"].astype(f32), params["b2"].astype(f32)
    g2, be2 = params["g2"].astype(f32), params["be2"].astype(f32)
    wo, bo = params["wo"].astype(f32), params["bo"].astype(f32)

    # Fold each LayerNorm's affine into the Linear that follows it:
    #   Linear(norm(h)*gamma + beta) == norm(h) @ (diag(gamma) @ W) + (beta @ W + b)
    w1f, b1f = fn_w.reshape(D, 1) * w1, fn_b @ w1 + b1
    w2f, b2f = g1.reshape(H, 1) * w2, be1 @ w2 + b2
    wof, bof = g2.reshape(H, 1) * wo, be2 @ wo + bo

    def tile_row(v):  # (1, H) -> (1, 128)
        return jnp.tile(v, (1, pack))

    rows = [tile_row(b1f), tile_row(b2f), jnp.broadcast_to(bof, (1, 128))]
    vecs = jnp.concatenate(rows + [jnp.zeros((8 - len(rows), 128), f32)], axis=0)

    return {
        "pack": pack,
        "dim": D,
        "w1_blk": jnp.kron(eye, w1f),   # (128, 128)  LN0 affine folded in
        "w2_blk": jnp.kron(eye, w2f),   # (128, 128)  LN1 affine folded in
        "wo_blk": jnp.kron(eye, wof),   # (128, pack) LN2 affine folded in
        "vecs": vecs,                   # (8, 128)    folded biases
    }


def critic_forward(x, packed, tbp_cap=4096):
    """x: (B, obs_dim). Returns (values (B, 1), rnn_states_out=None)."""
    B, D = x.shape
    pack = packed["pack"]
    assert packed["dim"] == D and pack * D == 128

    # Keep the native dtype of the dominant HBM read stream (f32/bf16 upcast in-kernel).
    if x.dtype not in (jnp.float32, jnp.bfloat16):
        x = x.astype(jnp.float32)

    # Minimal padding: only up to a multiple of `pack` (no copy when B % pack == 0).
    b_pack = _round_up(B, pack)
    if b_pack != B:
        x = jnp.concatenate([x, jnp.zeros((b_pack - B, D), x.dtype)], axis=0)
    rp = b_pack // pack
    x_packed = x.reshape(rp, pack * D)   # contiguous -> no data movement

    # Batch tile: as big as VMEM comfortably allows; force >=2 steps only on 2-TC chips.
    ncores = _tensorcores_per_chip()
    nsteps = pl.cdiv(rp, tbp_cap)
    if ncores > 1 and rp > 8 * ncores:
        nsteps = max(nsteps, ncores)
    if nsteps <= 1:
        tbp = rp                                           # single full-array block
    else:
        tbp = min(tbp_cap, _round_up(pl.cdiv(rp, nsteps), 8))
    grid = (pl.cdiv(rp, tbp),)                             # ragged tail -> partial (masked) block

    out = pl.pallas_call(
        functools.partial(critic_kernel, seg_dim=D),
        out_shape=jax.ShapeDtypeStruct((rp, pack), jnp.float32),
        grid_spec=pltpu.PrefetchScalarGridSpec(
            num_scalar_prefetch=0,
            grid=grid,
            in_specs=[
                pl.BlockSpec((tbp, 128), lambda i: (i, 0)),    # packed x tile
                pl.BlockSpec((128, 128), lambda i: (0, 0)),    # W1 block-diagonal
                pl.BlockSpec((128, 128), lambda i: (0, 0)),    # W2 block-diagonal
                pl.BlockSpec((128, pack), lambda i: (0, 0)),   # value-head block-diagonal
                pl.BlockSpec((8, 128), lambda i: (0, 0)),      # folded biases
            ],
            out_specs=pl.BlockSpec((tbp, pack), lambda i: (i, 0)),
        ),
        compiler_params=pltpu.CompilerParams(
            dimension_semantics=("parallel",),
            vmem_limit_bytes=48 * 1024 * 1024,
        ),
    )(x_packed, packed["w1_blk"], packed["w2_blk"], packed["wo_blk"], packed["vecs"])

    values = out.reshape(b_pack, 1)[:B]
    return values, None


# ----------------------------------------------------------------------------
# Deterministic parameter init (mirrors the module's orthogonal init scheme)
# ----------------------------------------------------------------------------
def _orthogonal(key, in_dim, out_dim, gain):
    # nn.init.orthogonal_ on a (out_dim, in_dim) weight; returned already transposed
    # to (in_dim, out_dim) so the kernel can do x @ W.
    a = jax.random.normal(key, (max(out_dim, in_dim), min(out_dim, in_dim)), jnp.float32)
    q, r = jnp.linalg.qr(a)
    q = q * jnp.sign(jnp.diagonal(r))[None, :]
    w = q[:out_dim, :in_dim] if out_dim >= in_dim else q[:in_dim, :out_dim].T
    return (gain * w).T.astype(jnp.float32)  # (in_dim, out_dim)


def init_params(key, obs_dim, hidden):
    relu_gain = jnp.sqrt(2.0)  # nn.init.calculate_gain('relu')
    k1, k2, k3 = jax.random.split(key, 3)
    return {
        "fn_w": jnp.ones((1, obs_dim), jnp.float32),
        "fn_b": jnp.zeros((1, obs_dim), jnp.float32),
        "w1": _orthogonal(k1, obs_dim, hidden, relu_gain),
        "b1": jnp.zeros((1, hidden), jnp.float32),
        "g1": jnp.ones((1, hidden), jnp.float32),
        "be1": jnp.zeros((1, hidden), jnp.float32),
        "w2": _orthogonal(k2, hidden, hidden, relu_gain),
        "b2": jnp.zeros((1, hidden), jnp.float32),
        "g2": jnp.ones((1, hidden), jnp.float32),
        "be2": jnp.zeros((1, hidden), jnp.float32),
        "wo": _orthogonal(k3, hidden, 1, 1.0),
        "bo": jnp.zeros((1, 1), jnp.float32),
    }


# Pure-JAX reference (uses the original, un-folded parameters) for sanity checking.
def _ref_forward(x, p):
    def ln(h, w, b):
        mu = jnp.mean(h, -1, keepdims=True)
        var = jnp.mean((h - mu) ** 2, -1, keepdims=True)
        return (h - mu) / jnp.sqrt(var + _LN_EPS) * w + b

    h = ln(x, p["fn_w"], p["fn_b"])
    h = ln(jnp.maximum(h @ p["w1"] + p["b1"], 0.0), p["g1"], p["be1"])
    h = ln(jnp.maximum(h @ p["w2"] + p["b2"], 0.0), p["g2"], p["be2"])
    return h @ p["wo"] + p["bo"]


if __name__ == "__main__":
    B, OBS_DIM, HIDDEN = 8, 32, 32

    key = jax.random.PRNGKey(0)
    kx, kp, kx2 = jax.random.split(key, 3)
    x = jax.random.normal(kx, (B, OBS_DIM), jnp.float32)
    params = init_params(kp, OBS_DIM, HIDDEN)
    packed = pack_params(params)

    values, rnn_states_out = critic_forward(x, packed)
    values = jax.block_until_ready(values)

    ref = _ref_forward(x, params)
    assert values.shape == (B, 1)
    assert rnn_states_out is None
    assert jnp.allclose(values, ref, atol=2e-3, rtol=2e-3), \
        float(jnp.max(jnp.abs(values - ref)))

    # Exercise the ragged-batch (pad-to-pack) and partial-last-tile (masked block) paths.
    x2 = jax.random.normal(kx2, (50, OBS_DIM), jnp.float32)
    v2, _ = critic_forward(x2, packed, tbp_cap=8)
    v2 = jax.block_until_ready(v2)
    ref2 = _ref_forward(x2, params)
    assert v2.shape == (50, 1)
    assert jnp.allclose(v2, ref2, atol=2e-3, rtol=2e-3), \
        float(jnp.max(jnp.abs(v2 - ref2)))

    print("KERNEL_OK")
</pallas_src>

<mosaic_0001>
module attributes {stable_mosaic.version = 11 : i64} {
  func.func @critic_kernel(%arg0: i32, %arg1: memref<2x128xf32, #tpu.memory_space<vmem>>, %arg2: memref<128x128xf32, #tpu.memory_space<vmem>>, %arg3: memref<128x128xf32, #tpu.memory_space<vmem>>, %arg4: memref<128x4xf32, #tpu.memory_space<vmem>>, %arg5: memref<8x128xf32, #tpu.memory_space<vmem>>, %arg6: memref<2x4xf32, #tpu.memory_space<vmem>>) attributes {dimension_semantics = [#tpu.dimension_semantics<parallel>], iteration_bounds = array<i64: 1>, scalar_prefetch = 0 : i64, scratch_operands = 0 : i64, tpu.core_type = #tpu.core_type<tc>, window_params = [{transform_indices = @transform_0, window_bounds = array<i64: 2, 128>}, {pipeline_mode = #tpu.pipeline_mode<synchronous>, transform_indices = @transform_1, window_bounds = array<i64: 128, 128>}, {pipeline_mode = #tpu.pipeline_mode<synchronous>, transform_indices = @transform_2, window_bounds = array<i64: 128, 128>}, {pipeline_mode = #tpu.pipeline_mode<synchronous>, transform_indices = @transform_3, window_bounds = array<i64: 128, 4>}, {pipeline_mode = #tpu.pipeline_mode<synchronous>, transform_indices = @transform_4, window_bounds = array<i64: 8, 128>}, {transform_indices = @transform_5, window_bounds = array<i64: 2, 4>}]} {
    %0 = tpu.iota {dimensions = array<i32: 0>} : vector<128x128xi32>
    %1 = tpu.iota {dimensions = array<i32: 1>} : vector<128x128xi32>
    %c-32_i32 = arith.constant -32 : i32
    %2 = vector.broadcast %c-32_i32 : i32 to vector<128x128xi32>
    %3 = arith.andi %0, %2 : vector<128x128xi32>
    %c-32_i32_0 = arith.constant -32 : i32
    %4 = vector.broadcast %c-32_i32_0 : i32 to vector<128x128xi32>
    %5 = arith.andi %1, %4 : vector<128x128xi32>
    %6 = arith.cmpi eq, %3, %5 : vector<128x128xi32>
    %7 = arith.extui %6 : vector<128x128xi1> to vector<128x128xi32>
    %8 = arith.sitofp %7 : vector<128x128xi32> to vector<128x128xf32>
    %cst = arith.constant 3.125000e-02 : f32
    %9 = vector.broadcast %cst : f32 to vector<128x128xf32>
    %10 = arith.mulf %8, %9 : vector<128x128xf32>
    %c0 = arith.constant 0 : index
    %c0_1 = arith.constant 0 : index
    %11 = vector.load %arg1[%c0, %c0_1] : memref<2x128xf32, #tpu.memory_space<vmem>>, vector<2x128xf32>
    %cst_2 = arith.constant dense<0.000000e+00> : vector<2x128xf32>
    %12 = tpu.matmul %11, %10, %cst_2 {dimension_numbers = #tpu.dot_dimension_numbers<[1], [0], [0], [1], [0, 0, 1, 1], [], []>, precision = #tpu.contract_precision<fp32>} : vector<2x128xf32>, vector<128x128xf32>, vector<2x128xf32> -> vector<2x128xf32>
    %13 = arith.mulf %11, %11 : vector<2x128xf32>
    %cst_3 = arith.constant dense<0.000000e+00> : vector<2x128xf32>
    %14 = tpu.matmul %13, %10, %cst_3 {dimension_numbers = #tpu.dot_dimension_numbers<[1], [0], [0], [1], [0, 0, 1, 1], [], []>, precision = #tpu.contract_precision<fp32>} : vector<2x128xf32>, vector<128x128xf32>, vector<2x128xf32> -> vector<2x128xf32>
    %15 = arith.mulf %12, %12 : vector<2x128xf32>
    %16 = arith.subf %14, %15 : vector<2x128xf32>
    %17 = arith.subf %11, %12 : vector<2x128xf32>
    %cst_4 = arith.constant 9.99999974E-6 : f32
    %18 = vector.broadcast %cst_4 : f32 to vector<2x128xf32>
    %19 = arith.addf %16, %18 : vector<2x128xf32>
    %20 = math.rsqrt %19 : vector<2x128xf32>
    %21 = arith.mulf %17, %20 : vector<2x128xf32>
    %c0_5 = arith.constant 0 : index
    %c0_6 = arith.constant 0 : index
    %22 = vector.load %arg2[%c0_5, %c0_6] : memref<128x128xf32, #tpu.memory_space<vmem>>, vector<128x128xf32>
    %cst_7 = arith.constant dense<0.000000e+00> : vector<2x128xf32>
    %23 = tpu.matmul %21, %22, %cst_7 {dimension_numbers = #tpu.dot_dimension_numbers<[1], [0], [0], [1], [0, 0, 1, 1], [], []>, precision = #tpu.contract_precision<fp32>} : vector<2x128xf32>, vector<128x128xf32>, vector<2x128xf32> -> vector<2x128xf32>
    %c0_8 = arith.constant 0 : index
    %c0_9 = arith.constant 0 : index
    %24 = vector.load %arg5[%c0_8, %c0_9] : memref<8x128xf32, #tpu.memory_space<vmem>>, vector<1x128xf32>
    %25 = vector.broadcast %24 : vector<1x128xf32> to vector<2x128xf32>
    %26 = arith.addf %23, %25 : vector<2x128xf32>
    %cst_10 = arith.constant 0.000000e+00 : f32
    %27 = vector.broadcast %cst_10 : f32 to vector<2x128xf32>
    %28 = arith.maximumf %26, %27 : vector<2x128xf32>
    %cst_11 = arith.constant dense<0.000000e+00> : vector<2x128xf32>
    %29 = tpu.matmul %28, %10, %cst_11 {dimension_numbers = #tpu.dot_dimension_numbers<[1], [0], [0], [1], [0, 0, 1, 1], [], []>, precision = #tpu.contract_precision<fp32>} : vector<2x128xf32>, vector<128x128xf32>, vector<2x128xf32> -> vector<2x128xf32>
    %30 = arith.mulf %28, %28 : vector<2x128xf32>
    %cst_12 = arith.constant dense<0.000000e+00> : vector<2x128xf32>
    %31 = tpu.matmul %30, %10, %cst_12 {dimension_numbers = #tpu.dot_dimension_numbers<[1], [0], [0], [1], [0, 0, 1, 1], [], []>, precision = #tpu.contract_precision<fp32>} : vector<2x128xf32>, vector<128x128xf32>, vector<2x128xf32> -> vector<2x128xf32>
    %32 = arith.mulf %29, %29 : vector<2x128xf32>
    %33 = arith.subf %31, %32 : vector<2x128xf32>
    %34 = arith.subf %28, %29 : vector<2x128xf32>
    %cst_13 = arith.constant 9.99999974E-6 : f32
    %35 = vector.broadcast %cst_13 : f32 to vector<2x128xf32>
    %36 = arith.addf %33, %35 : vector<2x128xf32>
    %37 = math.rsqrt %36 : vector<2x128xf32>
    %38 = arith.mulf %34, %37 : vector<2x128xf32>
    %c0_14 = arith.constant 0 : index
    %c0_15 = arith.constant 0 : index
    %39 = vector.load %arg3[%c0_14, %c0_15] : memref<128x128xf32, #tpu.memory_space<vmem>>, vector<128x128xf32>
    %cst_16 = arith.constant dense<0.000000e+00> : vector<2x128xf32>
    %40 = tpu.matmul %38, %39, %cst_16 {dimension_numbers = #tpu.dot_dimension_numbers<[1], [0], [0], [1], [0, 0, 1, 1], [], []>, precision = #tpu.contract_precision<fp32>} : vector<2x128xf32>, vector<128x128xf32>, vector<2x128xf32> -> vector<2x128xf32>
    %c1 = arith.constant 1 : index
    %c0_17 = arith.constant 0 : index
    %41 = vector.load %arg5[%c1, %c0_17] : memref<8x128xf32, #tpu.memory_space<vmem>>, vector<1x128xf32>
    %42 = vector.broadcast %41 : vector<1x128xf32> to vector<2x128xf32>
    %43 = arith.addf %40, %42 : vector<2x128xf32>
    %cst_18 = arith.constant 0.000000e+00 : f32
    %44 = vector.broadcast %cst_18 : f32 to vector<2x128xf32>
    %45 = arith.maximumf %43, %44 : vector<2x128xf32>
    %cst_19 = arith.constant dense<0.000000e+00> : vector<2x128xf32>
    %46 = tpu.matmul %45, %10, %cst_19 {dimension_numbers = #tpu.dot_dimension_numbers<[1], [0], [0], [1], [0, 0, 1, 1], [], []>, precision = #tpu.contract_precision<fp32>} : vector<2x128xf32>, vector<128x128xf32>, vector<2x128xf32> -> vector<2x128xf32>
    %47 = arith.mulf %45, %45 : vector<2x128xf32>
    %cst_20 = arith.constant dense<0.000000e+00> : vector<2x128xf32>
    %48 = tpu.matmul %47, %10, %cst_20 {dimension_numbers = #tpu.dot_dimension_numbers<[1], [0], [0], [1], [0, 0, 1, 1], [], []>, precision = #tpu.contract_precision<fp32>} : vector<2x128xf32>, vector<128x128xf32>, vector<2x128xf32> -> vector<2x128xf32>
    %49 = arith.mulf %46, %46 : vector<2x128xf32>
    %50 = arith.subf %48, %49 : vector<2x128xf32>
    %51 = arith.subf %45, %46 : vector<2x128xf32>
    %cst_21 = arith.constant 9.99999974E-6 : f32
    %52 = vector.broadcast %cst_21 : f32 to vector<2x128xf32>
    %53 = arith.addf %50, %52 : vector<2x128xf32>
    %54 = math.rsqrt %53 : vector<2x128xf32>
    %55 = arith.mulf %51, %54 : vector<2x128xf32>
    %c0_22 = arith.constant 0 : index
    %c0_23 = arith.constant 0 : index
    %56 = vector.load %arg4[%c0_22, %c0_23] : memref<128x4xf32, #tpu.memory_space<vmem>>, vector<128x4xf32>
    %cst_24 = arith.constant dense<0.000000e+00> : vector<2x4xf32>
    %57 = tpu.matmul %55, %56, %cst_24 {dimension_numbers = #tpu.dot_dimension_numbers<[1], [0], [0], [1], [0, 0, 1, 1], [], []>, precision = #tpu.contract_precision<fp32>} : vector<2x128xf32>, vector<128x4xf32>, vector<2x4xf32> -> vector<2x4xf32>
    %c2 = arith.constant 2 : index
    %c0_25 = arith.constant 0 : index
    %58 = vector.load %arg5[%c2, %c0_25] : memref<8x128xf32, #tpu.memory_space<vmem>>, vector<1x4xf32>
    %59 = vector.broadcast %58 : vector<1x4xf32> to vector<2x4xf32>
    %60 = arith.addf %57, %59 : vector<2x4xf32>
    %c0_26 = arith.constant 0 : index
    %c0_27 = arith.constant 0 : index
    %61 = vector.load %arg6[%c0_26, %c0_27] : memref<2x4xf32, #tpu.memory_space<vmem>>, vector<2x4xf32>
    tpu.vector_store %arg6[%c0_26, %c0_27], %60 {strides = array<i32>} : memref<2x4xf32, #tpu.memory_space<vmem>>, vector<2x4xf32>,
    return
  }
  func.func @transform_0(%arg0: i32) -> (i32, i32) {
    %c0_i32 = arith.constant 0 : i32
    %c0_i32_0 = arith.constant 0 : i32
    return %arg0, %c0_i32 : i32, i32
  }
  func.func @transform_1(%arg0: i32) -> (i32, i32) {
    %c0_i32 = arith.constant 0 : i32
    %c0_i32_0 = arith.constant 0 : i32
    %c0_i32_1 = arith.constant 0 : i32
    return %c0_i32, %c0_i32_0 : i32, i32
  }
  func.func @transform_2(%arg0: i32) -> (i32, i32) {
    %c0_i32 = arith.constant 0 : i32
    %c0_i32_0 = arith.constant 0 : i32
    %c0_i32_1 = arith.constant 0 : i32
    return %c0_i32, %c0_i32_0 : i32, i32
  }
  func.func @transform_3(%arg0: i32) -> (i32, i32) {
    %c0_i32 = arith.constant 0 : i32
    %c0_i32_0 = arith.constant 0 : i32
    %c0_i32_1 = arith.constant 0 : i32
    return %c0_i32, %c0_i32_0 : i32, i32
  }
  func.func @transform_4(%arg0: i32) -> (i32, i32) {
    %c0_i32 = arith.constant 0 : i32
    %c0_i32_0 = arith.constant 0 : i32
    %c0_i32_1 = arith.constant 0 : i32
    return %c0_i32, %c0_i32_0 : i32, i32
  }
  func.func @transform_5(%arg0: i32) -> (i32, i32) {
    %c0_i32 = arith.constant 0 : i32
    %c0_i32_0 = arith.constant 0 : i32
    return %arg0, %c0_i32 : i32, i32
  }
}

</mosaic_0001>

<bundles_post_ra>
// kernel: tpu_custom_call.1
= control target key start
LH: loop header
LB: loop body
LE: loop exit
PB: predicated region body
PF: predicated region fallthrough
CT: control target
= control target key end

     0   :  { %10 = vsyncpa [#allocation3], 0  ;;  %s12343_s0 = inlined_call_operand.vmem [shape: f32[2,128], index: 0, kind: input, shape index: {}]   ;;  %s12344_s1 = inlined_call_operand.vmem [shape: f32[128,128], index: 1, kind: input, shape index: {}]   ;;  %s12345_s2 = inlined_call_operand.hbm [shape: f32[128,128], index: 2, kind: input, shape index: {}]   ;;  %s12346_s3 = inlined_call_operand.vmem [shape: f32[128,4], index: 3, kind: input, shape index: {}]   ;;  %s12347_s4 = inlined_call_operand.vmem [shape: f32[8,128], index: 4, kind: input, shape index: {}]   ;;  %s12348_s5 = inlined_call_operand.hbm [shape: f32[2,4], index: 5, kind: output, shape index: {}]  }
   0x1   :  { %11 = vsyncpa [#allocation4], 0  ;;  %s10284_s18 = smov [#allocation2]   ;;  %s10236_s22 = scalar_lea.hbm %s12345_s2, 2048 }
   0x2   :  { %s21_s19 = sshll.u32 %s10284_s18, 4  ;;  %p10237_p0 = scmp.ne.s32.totalorder %s12345_s2, %s10236_s22  ;;  %s22_s19 = int_to_ptr.vmem [resolvable:$true] %s21_s19 }
   0x3   :  { %p10240_p1 = scmp.lt.u32.totalorder %s10236_s22, %s12345_s2 }
   0x5   :  { %p10242_p2 = pnand %p10240_p1, %p10237_p0 }
   0x7   :  { %10245 = shalt.err (!%p10242_p2)
}
   0x8   :  { %s10246_s27 = scalar_lea.vmem %s22_s19, 2048  ;;  %p10251_p4 = scmp.lt.s32.totalorder %s22_s19, %s22_s19 }
   0x9   :  { %p10247_p3 = scmp.ne.s32.totalorder %s22_s19, %s10246_s27  ;;  %p10252_p5 = scmp.lt.s32.totalorder %s10246_s27, %s10246_s27 }
   0xb   :  { %p10253_p6 = por %p10252_p5, %p10251_p4 }
   0xd   :  { %p10254_p7 = pnand %p10253_p6, %p10247_p3 }
   0xf   :  { %10257 = shalt.err (!%p10254_p7)
}
  0x10   :  { %s10285_s28 = smov 128   ;;  %s10286_s29 = smov 8   ;;  %v35_v0 = vlaneseq }
  0x11   :  { %27 = dma.hbm_to_vmem [thread:$0]  %s12345_s2, 2048, %s22_s19, [#allocation3], %s10285_s28, %s10285_s28, %s10286_s29  }
  0x12   :  { %10280 = dma.done.wait [#allocation3], 2048  }
  0x13   :  { %10281 = vsyncadd [#allocation3], 4294965248  ;;  %v12373_v1 = vmov 0.0|0.0   ;;  %v10335_v2 = vshrl.u32 %v35_v0, 7  ;;  %v53_v3 = vand.u32 127, %v35_v0  ;;  %vm10288_vm0 = vmmov 0  }
  0x14   :  { %8835 = vmatprep.subr.bf16.mxu1 %v12373_v1  ;;  %8907 = vmatprep.subr.bf16.mxu0 %v12373_v1  ;;  %v12349_v4 = vmov 0.0   ;;  %s10290_s20 = smov [#allocation5]  }
  0x15   :  { %6977 = vmatprep.mubr.msk.f32.mxu1 %vm10288_vm0, %v12349_v4  ;;  %7082 = vmatprep.mubr.msk.f32.mxu0 %vm10288_vm0, %v12349_v4  ;;  %v37_v5 = vadd.s32 8, %v10335_v2  ;;  %v54_v6 = vand.u32 4294967264, %v10335_v2  ;;  %v10343_v7 = vand.u32 4294967264, %v53_v3  ;;  %v38_v8 = vadd.s32 16, %v10335_v2  ;;  %s5999_s21 = sshll.u32 %s10290_s20, 4  ;;  %s6000_s21 = int_to_ptr.vmem [resolvable:$true] %s5999_s21 }
  0x16   :  { %v39_v9 = vadd.s32 24, %v10335_v2  ;;  %v40_v10 = vadd.s32 32, %v10335_v2  ;;  %v41_v11 = vadd.s32 40, %v10335_v2  ;;  %v42_v12 = vadd.s32 48, %v10335_v2  ;;  %s10258_s22 = scalar_lea.vmem %s6000_s21, 32  ;;  %p10263_p9 = scmp.lt.s32.totalorder %s6000_s21, %s6000_s21 }
  0x17   :  { %v55_v13 = vand.u32 4294967264, %v37_v5  ;;  %vm71_vm1 = vcmp.eq.s32.totalorder %v54_v6, %v10343_v7  ;;  %v56_v14 = vand.u32 4294967264, %v38_v8  ;;  %v43_v15 = vadd.s32 56, %v10335_v2  ;;  %p10259_p8 = scmp.ne.s32.totalorder %s6000_s21, %s10258_s22  ;;  %p10264_p10 = scmp.lt.s32.totalorder %s10258_s22, %s10258_s22 }
  0x18   :  { %v6008_v16 = vsel %vm71_vm1, 1.0, %v12349_v4  ;;  %v57_v17 = vand.u32 4294967264, %v39_v9  ;;  %v58_v18 = vand.u32 4294967264, %v40_v10  ;;  %v59_v19 = vand.u32 4294967264, %v41_v11  ;;  %v10445_v10 = vld [vmem:[%s12343_s0] sm:$0x3] }
  0x19   :  { %vm72_vm2 = vcmp.eq.s32.totalorder %v55_v13, %v10343_v7  ;;  %v10354_v20 = vmul.f32 0.03125, %v6008_v16  ;;  %vm73_vm3 = vcmp.eq.s32.totalorder %v56_v14, %v10343_v7  ;;  %v60_v21 = vand.u32 4294967264, %v42_v12  ;;  %p10265_p11 = por %p10264_p10, %p10263_p9 }
  0x1a   :  { %v6009_v22 = vsel %vm72_vm2, 1.0, %v12349_v4  ;;  %vm74_vm4 = vcmp.eq.s32.totalorder %v57_v17, %v10343_v7  ;;  %v6010_v23 = vsel %vm73_vm3, 1.0, %v12349_v4  ;;  %vm75_vm5 = vcmp.eq.s32.totalorder %v58_v18, %v10343_v7 }
  0x1b   :  { %v10361_v24 = vmul.f32 0.03125, %v6009_v22  ;;  %v137_v25 = vand.u32 4294901760, %v10354_v20  ;;  %v6011_v26 = vsel %vm74_vm4, 1.0, %v12349_v4  ;;  %v10365_v27 = vmul.f32 0.03125, %v6010_v23  ;;  %p10266_p12 = pnand %p10265_p11, %p10259_p8 }
  0x1c   :  { %v10367_v28 = vmul.f32 0.03125, %v6011_v26  ;;  %vm76_vm6 = vcmp.eq.s32.totalorder %v59_v19, %v10343_v7  ;;  %v6012_v29 = vsel %vm75_vm5, 1.0, %v12349_v4  ;;  %v61_v30 = vand.u32 4294967264, %v43_v15 }
  0x1d   :  { %v140_v31 = vand.u32 4294901760, %v10361_v24  ;;  %v143_v32 = vand.u32 4294901760, %v10365_v27  ;;  %v6013_v33 = vsel %vm76_vm6, 1.0, %v12349_v4  ;;  %v10374_v34 = vmul.f32 0.03125, %v6012_v29 }
  0x1e   :  { %v146_v35 = vand.u32 4294901760, %v10367_v28  ;;  %v10377_v36 = vmul.f32 0.03125, %v6013_v33  ;;  %vm77_vm7 = vcmp.eq.s32.totalorder %v60_v21, %v10343_v7  ;;  %vm78_vm8 = vcmp.eq.s32.totalorder %v61_v30, %v10343_v7 }
  0x1f   :  { %v10385_v37 = vpack.c.bf16 %v140_v31, %v137_v25  ;;  %v149_v38 = vand.u32 4294901760, %v10374_v34  ;;  %v6014_v39 = vsel %vm77_vm7, 1.0, %v12349_v4  ;;  %v6015_v40 = vsel %vm78_vm8, 1.0, %v12349_v4 }
  0x20   :  { %v10394_v41 = vpack.c.bf16 %v146_v35, %v143_v32  ;;  %v152_v42 = vand.u32 4294901760, %v10377_v36  ;;  %v10397_v43 = vmul.f32 0.03125, %v6014_v39  ;;  %v10399_v44 = vmul.f32 0.03125, %v6015_v40 }
  0x21   :  { %8837 = vmatpush3.bf16.msra.mxu1 %v10385_v37  ;;  %8909 = vmatpush3.bf16.msra.mxu0 %v10385_v37  ;;  %v44_v45 = vadd.s32 64, %v10335_v2  ;;  %v45_v46 = vadd.s32 72, %v10335_v2  ;;  %v46_v47 = vadd.s32 80, %v10335_v2  ;;  %v47_v48 = vadd.s32 88, %v10335_v2 }
  0x22   :  { %8838 = vmatprep.subr.bf16.mxu1 %v12373_v1  ;;  %8910 = vmatprep.subr.bf16.mxu0 %v12373_v1  ;;  %v10413_v49 = vpack.c.bf16 %v152_v42, %v149_v38  ;;  %v155_v50 = vand.u32 4294901760, %v10397_v43  ;;  %v48_v51 = vadd.s32 96, %v10335_v2  ;;  %v158_v56 = vand.u32 4294901760, %v10399_v44 }
  0x23   :  { %v62_v52 = vand.u32 4294967264, %v44_v45  ;;  %v63_v53 = vand.u32 4294967264, %v45_v46  ;;  %v64_v54 = vand.u32 4294967264, %v46_v47  ;;  %v65_v55 = vand.u32 4294967264, %v47_v48 }
  0x24   :  { %v49_v57 = vadd.s32 104, %v10335_v2  ;;  %v66_v58 = vand.u32 4294967264, %v48_v51  ;;  %v50_v59 = vadd.s32 112, %v10335_v2  ;;  %v51_v60 = vadd.s32 120, %v10335_v2 }
  0x25   :  { %8840 = vmatpush3.bf16.msra.mxu1 %v10394_v41  ;;  %8912 = vmatpush3.bf16.msra.mxu0 %v10394_v41  ;;  %vm79_vm9 = vcmp.eq.s32.totalorder %v62_v52, %v10343_v7  ;;  %vm80_vm10 = vcmp.eq.s32.totalorder %v63_v53, %v10343_v7  ;;  %vm81_vm11 = vcmp.eq.s32.totalorder %v64_v54, %v10343_v7  ;;  %v10465_v18 = vand.u32 4294901760, %v10445_v10 }
  0x26   :  { %8841 = vmatprep.subr.bf16.mxu1 %v12373_v1  ;;  %8913 = vmatprep.subr.bf16.mxu0 %v12373_v1  ;;  %v6016_v61 = vsel %vm79_vm9, 1.0, %v12349_v4  ;;  %v6017_v62 = vsel %vm80_vm10, 1.0, %v12349_v4  ;;  %vm82_vm12 = vcmp.eq.s32.totalorder %v65_v55, %v10343_v7  ;;  %v6018_v63 = vsel %vm81_vm11, 1.0, %v12349_v4 }
  0x27   :  { %v10432_v0 = vmul.f32 0.03125, %v6016_v61  ;;  %v10434_v3 = vmul.f32 0.03125, %v6017_v62  ;;  %v6019_v5 = vsel %vm82_vm12, 1.0, %v12349_v4  ;;  %v10437_v6 = vmul.f32 0.03125, %v6018_v63 }
  0x28   :  { %v10439_v2 = vmul.f32 0.03125, %v6019_v5  ;;  %v67_v8 = vand.u32 4294967264, %v49_v57  ;;  %vm83_vm13 = vcmp.eq.s32.totalorder %v66_v58, %v10343_v7  ;;  %v68_v9 = vand.u32 4294967264, %v50_v59 }
  0x29   :  { %8843 = vmatpush3.bf16.msra.mxu1 %v10413_v49  ;;  %8915 = vmatpush3.bf16.msra.mxu0 %v10413_v49  ;;  %v10453_v11 = vpack.c.bf16 %v158_v56, %v155_v50  ;;  %v161_v12 = vand.u32 4294901760, %v10432_v0  ;;  %v164_v13 = vand.u32 4294901760, %v10434_v3  ;;  %v6020_v14 = vsel %vm83_vm13, 1.0, %v12349_v4 }
  0x2a   :  { %8844 = vmatprep.subr.bf16.mxu1 %v12373_v1  ;;  %8916 = vmatprep.subr.bf16.mxu0 %v12373_v1  ;;  %vm84_vm14 = vcmp.eq.s32.totalorder %v67_v8, %v10343_v7  ;;  %v69_v15 = vand.u32 4294967264, %v51_v60  ;;  %v167_v16 = vand.u32 4294901760, %v10437_v6  ;;  %vm85_vm15 = vcmp.eq.s32.totalorder %v68_v9, %v10343_v7 }
  0x2b   :  { %v6021_v17 = vsel %vm84_vm14, 1.0, %v12349_v4  ;;  %v170_v19 = vand.u32 4294901760, %v10439_v2  ;;  %v10468_v21 = vmul.f32 0.03125, %v6020_v14  ;;  %v10479_v23 = vpack.c.bf16 %v164_v13, %v161_v12 }
  0x2c   :  { %v10470_v22 = vmul.f32 0.03125, %v6021_v17  ;;  %vm86_vm1 = vcmp.eq.s32.totalorder %v69_v15, %v10343_v7  ;;  %v6022_v26 = vsel %vm85_vm15, 1.0, %v12349_v4  ;;  %v10486_v30 = vsub.f32 %v10354_v20, %v137_v25 }
  0x2d   :  { %8846 = vmatpush3.bf16.msra.mxu1 %v10453_v11  ;;  %8918 = vmatpush3.bf16.msra.mxu0 %v10453_v11  ;;  %v6023_v29 = vsel %vm86_vm1, 1.0, %v12349_v4  ;;  %v10493_v7 = vsub.f32 %v10361_v24, %v140_v31  ;;  %v10495_v33 = vmul.f32 0.03125, %v6022_v26  ;;  %v10501_v40 = vsub.f32 %v10445_v10, %v10465_v18 }
  0x2e   :  { %8847 = vmatprep.subr.bf16.mxu1 %v12373_v1  ;;  %8919 = vmatprep.subr.bf16.mxu0 %v12373_v1  ;;  %v10497_v39 = vmul.f32 0.03125, %v6023_v29  ;;  %v173_v20 = vand.u32 4294901760, %v10468_v21  ;;  %v176_v25 = vand.u32 4294901760, %v10470_v22  ;;  %v230_v45 = vand.u32 4294901760, %v10486_v30 }
  0x2f   :  { %v10509_v46 = vsub.f32 %v10365_v27, %v143_v32  ;;  %v10517_v24 = vpack.c.bf16 %v170_v19, %v167_v16  ;;  %v237_v31 = vand.u32 4294901760, %v10493_v7  ;;  %v10523_v47 = vsub.f32 %v10367_v28, %v146_v35 }
  0x30   :  { %v179_v27 = vand.u32 4294901760, %v10495_v33  ;;  %v182_v32 = vand.u32 4294901760, %v10497_v39  ;;  %v219_v48 = vand.u32 4294901760, %v10501_v40  ;;  %v10534_v51 = vpack.c.bf16 %v176_v25, %v173_v20 }
  0x31   :  { %8849 = vmatpush3.bf16.msra.mxu1 %v10479_v23  ;;  %8921 = vmatpush3.bf16.msra.mxu0 %v10479_v23  ;;  %v231_v52 = vsub.f32 %v10486_v30, %v230_v45  ;;  %v244_v28 = vand.u32 4294901760, %v10509_v46  ;;  %v238_v35 = vsub.f32 %v10493_v7, %v237_v31  ;;  %v251_v53 = vand.u32 4294901760, %v10523_v47 }
  0x32   :  { %8850 = vmatprep.subr.bf16.mxu1 %v12373_v1  ;;  %8922 = vmatprep.subr.bf16.mxu0 %v12373_v1  ;;  %12472 = vst [vmem:[#allocation8_spill] sm:$0xff] %v10534_v51  ;;  %v10545_v54 = vsub.f32 %v10374_v34, %v149_v38  ;;  %v10550_v55 = vsub.f32 %v10377_v36, %v152_v42 }
  0x33   :  { %v10558_v57 = vpack.c.bf16 %v182_v32, %v179_v27  ;;  %v220_v58 = vsub.f32 %v10501_v40, %v219_v48  ;;  %v232_v59 = vand.u32 4294901760, %v231_v52  ;;  %v245_v34 = vsub.f32 %v10509_v46, %v244_v28 }
  0x34   :  { %v10565_v36 = vsub.f32 %v10397_v43, %v155_v50  ;;  %v10570_v38 = vsub.f32 %v10399_v44, %v158_v56  ;;  %v239_v42 = vand.u32 4294901760, %v238_v35  ;;  %v252_v60 = vsub.f32 %v10523_v47, %v251_v53 }
  0x35   :  { %8852 = vmatpush3.bf16.msra.mxu1 %v10517_v24  ;;  %8924 = vmatpush3.bf16.msra.mxu0 %v10517_v24  ;;  %12473 = vst [vmem:[#allocation9_spill] sm:$0xff] %v10558_v57  ;;  %v258_v61 = vand.u32 4294901760, %v10545_v54  ;;  %v265_v62 = vand.u32 4294901760, %v10550_v55  ;;  %v221_v43 = vand.u32 4294901760, %v220_v58  ;;  %v10579_v50 = vpack.c.bf16 %v237_v31, %v230_v45 }
  0x36   :  { %8853 = vmatprep.subr.bf16.mxu1 %v12373_v1  ;;  %8925 = vmatprep.subr.bf16.mxu0 %v12373_v1  ;;  %v10584_v44 = vsub.f32 %v10432_v0, %v161_v12  ;;  %v246_v56 = vand.u32 4294901760, %v245_v34  ;;  %v272_v63 = vand.u32 4294901760, %v10565_v36  ;;  %v279_v5 = vand.u32 4294901760, %v10570_v38 }
  0x37   :  { %12474 = vst [vmem:[#allocation10_spill] sm:$0xff] %v10579_v50  ;;  %v10591_v8 = vsub.f32 %v10434_v3, %v164_v13  ;;  %v10595_v9 = vpack.c.bf16 %v239_v42, %v232_v59  ;;  %v253_v14 = vand.u32 4294901760, %v252_v60  ;;  %v259_v0 = vsub.f32 %v10545_v54, %v258_v61 }
  0x38   :  { %v266_v12 = vsub.f32 %v10550_v55, %v265_v62  ;;  %v10601_v15 = vpack.c.bf16 %v251_v53, %v244_v28  ;;  %v286_v3 = vand.u32 4294901760, %v10584_v44  ;;  %v273_v13 = vsub.f32 %v10565_v36, %v272_v63 }
  0x39   :  { %8855 = vmatpush3.bf16.msra.mxu1 %v10534_v51  ;;  %8927 = vmatpush3.bf16.msra.mxu0 %v10534_v51  ;;  %12475 = vst [vmem:[#allocation11_spill] sm:$0xff] %v10595_v9  ;;  %v280_v17 = vsub.f32 %v10570_v38, %v279_v5  ;;  %v293_v26 = vand.u32 4294901760, %v10591_v8  ;;  %v10610_v29 = vsub.f32 %v10437_v6, %v167_v16  ;;  %v260_v31 = vand.u32 4294901760, %v259_v0 }
  0x3a   :  { %8856 = vmatprep.subr.bf16.mxu1 %v12373_v1  ;;  %8928 = vmatprep.subr.bf16.mxu0 %v12373_v1  ;;  %12476 = vst [vmem:[#allocation12_spill] sm:$0xff] %v10601_v15  ;;  %v10614_v45 = vpack.c.bf16 %v253_v14, %v246_v56  ;;  %v267_v52 = vand.u32 4294901760, %v266_v12  ;;  %v10623_v28 = vpack.c.bf16 %v265_v62, %v258_v61  ;;  %v274_v16 = vand.u32 4294901760, %v273_v13 }
  0x3b   :  { %v287_v6 = vsub.f32 %v10584_v44, %v286_v3  ;;  %v281_v35 = vand.u32 4294901760, %v280_v17  ;;  %v294_v53 = vsub.f32 %v10591_v8, %v293_v26  ;;  %v10640_v59 = vsub.f32 %v10468_v21, %v173_v20 }
  0x3c   :  { %12477 = vst [vmem:[#allocation13_spill] sm:$0xff] %v10614_v45  ;;  %12478 = vst [vmem:[#allocation14_spill] sm:$0xff] %v10623_v28  ;;  %v10645_v34 = vsub.f32 %v10470_v22, %v176_v25  ;;  %v10649_v42 = vpack.c.bf16 %v279_v5, %v272_v63  ;;  %v10657_v21 = vsub.f32 %v10495_v33, %v179_v27 }
  0x3d   :  { %8858 = vmatpush3.bf16.msra.mxu1 %v10558_v57  ;;  %8930 = vmatpush3.bf16.msra.mxu0 %v10558_v57  ;;  %v288_v60 = vand.u32 4294901760, %v287_v6  ;;  %v10651_v61 = vpack.c.bf16 %v281_v35, %v274_v16  ;;  %v295_v62 = vand.u32 4294901760, %v294_v53  ;;  %v314_v20 = vand.u32 4294901760, %v10640_v59 }
  0x3e   :  { %8859 = vmatprep.subr.bf16.mxu1 %v12373_v1  ;;  %8931 = vmatprep.subr.bf16.mxu0 %v12373_v1  ;;  %12480 = vst [vmem:[#allocation16_spill] sm:$0xff] %v10649_v42  ;;  %v321_v25 = vand.u32 4294901760, %v10645_v34  ;;  %v10667_v56 = vsub.f32 %v10497_v39, %v182_v32  ;;  %v10673_v27 = vpack.c.bf16 %v293_v26, %v286_v3  ;;  %v328_v5 = vand.u32 4294901760, %v10657_v21 }
  0x3f   :  { %12481 = vst [vmem:[#allocation17_spill] sm:$0xff] %v10651_v61  ;;  %v10671_v33 = vpack.c.bf16 %v295_v62, %v288_v60  ;;  %v315_v0 = vsub.f32 %v10640_v59, %v314_v20  ;;  %v10723_v60 = vpack.c.bf16 %v10523_v47, %v10509_v46  ;;  %v10751_v46 = vpack.c.bf16 %v10591_v8, %v10584_v44 }
  0x40   :  { %6978 = vmatmul.mubr.f32.vlgmr.msra.gmra.mrb[0].mxu1 %v221_v43  ;;  %7083 = vmatmul.mubr.f32.vlgmr.msra.gmra.mrb[0].mxu0 %v219_v48  ;;  %v10619_v48 = vsub.f32 %v10439_v2, %v170_v19  ;;  %v300_v2 = vand.u32 4294901760, %v10610_v29  ;;  %v10634_v19 = vpack.c.bf16 %v267_v52, %v260_v31  ;;  %12483 = vst [vmem:[#allocation19_spill] sm:$0xff] %v10673_v27  ;;  %v335_v32 = vand.u32 4294901760, %v10667_v56 }
  0x41   :  { %8861 = vmatpush3.bf16.msra.mxu1 %v10595_v9  ;;  %8933 = vmatpush3.bf16.msra.mxu0 %v10579_v50  ;;  %12482 = vst [vmem:[#allocation18_spill] sm:$0xff] %v10671_v33  ;;  %v322_v39 = vsub.f32 %v10645_v34, %v321_v25  ;;  %v329_v3 = vsub.f32 %v10657_v21, %v328_v5  ;;  %v316_v17 = vand.u32 4294901760, %v315_v0  ;;  %12491 = vst [vmem:[#allocation27_spill] sm:$0xff] %v10723_v60 }
  0x42   :  { %8862 = vmatprep.subr.bf16.mxu1 %v12373_v1  ;;  %8934 = vmatprep.subr.bf16.mxu0 %v12373_v1  ;;  %12479 = vst [vmem:[#allocation15_spill] sm:$0xff] %v10634_v19  ;;  %v307_v58 = vand.u32 4294901760, %v10619_v48  ;;  %v301_v43 = vsub.f32 %v10610_v29, %v300_v2  ;;  %v336_v31 = vsub.f32 %v10667_v56, %v335_v32  ;;  %12494 = vst [vmem:[#allocation30_spill] sm:$0xff] %v10751_v46 }
  0x43   :  { %7012 = vmatprep.mubr.msk.f32.mxu1 %vm10288_vm0, %v12349_v4  ;;  %7117 = vmatprep.mubr.msk.f32.mxu0 %vm10288_vm0, %v12349_v4  ;;  %v323_v26 = vand.u32 4294901760, %v322_v39  ;;  %v10697_v6 = vpack.c.bf16 %v321_v25, %v314_v20  ;;  %v330_v16 = vand.u32 4294901760, %v329_v3  ;;  %v10759_v47 = vpack.c.bf16 %v10619_v48, %v10610_v29  ;;  %v1425_v29 = vld [vmem:[%s12344_s1] sm:$0xff] }
  0x44   :  { %v308_v22 = vsub.f32 %v10619_v48, %v307_v58  ;;  %v302_v63 = vand.u32 4294901760, %v301_v43  ;;  %v10683_v12 = vpack.c.bf16 %v307_v58, %v300_v2  ;;  %v337_v35 = vand.u32 4294901760, %v336_v31  ;;  %v1426_v48 = vld [vmem:[%s12344_s1 + $0x8] sm:$0xff]  ;;  %v1429_v3 = vld [vmem:[%s12344_s1 + $0x20] sm:$0xff] }
  0x45   :  { %8864 = vmatpush3.bf16.msra.mxu1 %v10614_v45  ;;  %8936 = vmatpush3.bf16.msra.mxu0 %v10601_v15  ;;  %v10695_v52 = vpack.c.bf16 %v323_v26, %v316_v17  ;;  %12487 = vst [vmem:[#allocation23_spill] sm:$0xff] %v10697_v6  ;;  %v10705_v2 = vpack.c.bf16 %v335_v32, %v328_v5  ;;  %12495 = vst [vmem:[#allocation31_spill] sm:$0xff] %v10759_v47  ;;  %v1427_v5 = vld [vmem:[%s12344_s1 + $0x10] sm:$0xff]  ;;  %v1430_v17 = vld [vmem:[%s12344_s1 + $0x28] sm:$0xff]  ;;  %v1459_v26 = vand.u32 4294901760, %v1429_v3 }
  0x46   :  { %8865 = vmatprep.subr.bf16.mxu1 %v12373_v1  ;;  %8937 = vmatprep.subr.bf16.mxu0 %v12373_v1  ;;  %v309_v14 = vand.u32 4294901760, %v308_v22  ;;  %12484 = vst [vmem:[#allocation20_spill] sm:$0xff] %v10683_v12  ;;  %v10703_v53 = vpack.c.bf16 %v337_v35, %v330_v16  ;;  %v10713_v58 = vpack.c.bf16 %v10493_v7, %v10486_v30  ;;  %v1453_v0 = vand.u32 4294901760, %v1427_v5  ;;  %v1431_v35 = vld [vmem:[%s12344_s1 + $0x30] sm:$0xff] }
  0x47   :  { %12486 = vst [vmem:[#allocation22_spill] sm:$0xff] %v10695_v52  ;;  %12489 = vst [vmem:[#allocation25_spill] sm:$0xff] %v10705_v2  ;;  %v10735_v30 = vpack.c.bf16 %v10550_v55, %v10545_v54  ;;  %v10743_v7 = vpack.c.bf16 %v10570_v38, %v10565_v36  ;;  %v10767_v54 = vpack.c.bf16 %v10645_v34, %v10640_v59  ;;  %v1447_v59 = vand.u32 4294901760, %v1425_v29 }
  0x48   :  { %v10688_v13 = vpack.c.bf16 %v309_v14, %v302_v63  ;;  %12488 = vst [vmem:[#allocation24_spill] sm:$0xff] %v10703_v53  ;;  %12490 = vst [vmem:[#allocation26_spill] sm:$0xff] %v10713_v58  ;;  %v10775_v55 = vpack.c.bf16 %v10667_v56, %v10657_v21  ;;  %v777_v36 = vmul.f32 %v10445_v10, %v10445_v10  ;;  %v1450_v34 = vand.u32 4294901760, %v1426_v48  ;;  %v1428_v14 = vld [vmem:[%s12344_s1 + $0x18] sm:$0xff] }
  0x49   :  { %8867 = vmatpush3.bf16.msra.mxu1 %v10634_v19  ;;  %8939 = vmatpush3.bf16.msra.mxu0 %v10623_v28  ;;  %12492 = vst [vmem:[#allocation28_spill] sm:$0xff] %v10735_v30  ;;  %12493 = vst [vmem:[#allocation29_spill] sm:$0xff] %v10743_v7  ;;  %v10858_v43 = vsub.f32 %v1425_v29, %v1447_v59  ;;  %v1456_v39 = vand.u32 4294901760, %v1428_v14  ;;  %v1462_v31 = vand.u32 4294901760, %v1430_v17 }
  0x4a   :  { %8868 = vmatprep.subr.bf16.mxu1 %v12373_v1  ;;  %8940 = vmatprep.subr.bf16.mxu0 %v12373_v1  ;;  %12485 = vst [vmem:[#allocation21_spill] sm:$0xff] %v10688_v13  ;;  %12496 = vst [vmem:[#allocation32_spill] sm:$0xff] %v10767_v54  ;;  %v10856_v62 = vpack.c.bf16 %v1450_v34, %v1447_v59  ;;  %v10860_v21 = vsub.f32 %v1426_v48, %v1450_v34  ;;  %v1435_v34 = vld [vmem:[%s12344_s1 + $0x50] sm:$0xff] }
  0x4b   :  { %12497 = vst [vmem:[#allocation33_spill] sm:$0xff] %v10775_v55  ;;  %v10952_v32 = vpack.c.bf16 %v1456_v39, %v1453_v0  ;;  %v10962_v16 = vpack.c.bf16 %v1462_v31, %v1459_v26 }
  0x4d   :  { %8870 = vmatpush3.bf16.msra.mxu1 %v10651_v61  ;;  %8942 = vmatpush3.bf16.msra.mxu0 %v10649_v42 }
  0x4e   :  { %8871 = vmatprep.subr.bf16.mxu1 %v12373_v1  ;;  %8943 = vmatprep.subr.bf16.mxu0 %v12373_v1 }
  0x51   :  { %8873 = vmatpush3.bf16.msra.mxu1 %v10671_v33  ;;  %8945 = vmatpush3.bf16.msra.mxu0 %v10673_v27 }
  0x52   :  { %8874 = vmatprep.subr.bf16.mxu1 %v12373_v1  ;;  %8946 = vmatprep.subr.bf16.mxu0 %v12373_v1 }
  0x55   :  { %8876 = vmatpush3.bf16.msra.mxu1 %v10688_v13  ;;  %8948 = vmatpush3.bf16.msra.mxu0 %v10683_v12 }
  0x56   :  { %8877 = vmatprep.subr.bf16.mxu1 %v12373_v1  ;;  %8949 = vmatprep.subr.bf16.mxu0 %v12373_v1 }
  0x59   :  { %8879 = vmatpush3.bf16.msra.mxu1 %v10695_v52  ;;  %8951 = vmatpush3.bf16.msra.mxu0 %v10697_v6 }
  0x5a   :  { %8880 = vmatprep.subr.bf16.mxu1 %v12373_v1  ;;  %8952 = vmatprep.subr.bf16.mxu0 %v12373_v1 }
  0x5d   :  { %8882 = vmatpush3.bf16.msra.mxu1 %v10703_v53  ;;  %8954 = vmatpush3.bf16.msra.mxu0 %v10705_v2 }
  0x5e   :  { %8883 = vmatprep.subr.bf16.mxu1 %v12373_v1  ;;  %8955 = vmatprep.subr.bf16.mxu0 %v12373_v1 }
  0x60   :  { %7013 = vmatmul.mubr.f32.vlgmr.msra.gmra.mrb[0].mxu1 %v10465_v18  ;;  %7118 = vmatmul.mubr.f32.vlgmr.msra.gmra.mrb[0].mxu0 %v10465_v18 }
  0x61   :  { %8885 = vmatpush3.bf16.msra.mxu1 %v10713_v58  ;;  %8957 = vmatpush3.bf16.msra.mxu0 %v10385_v37 }
  0x62   :  { %8886 = vmatprep.subr.bf16.mxu1 %v12373_v1  ;;  %8958 = vmatprep.subr.bf16.mxu0 %v12373_v1 }
  0x63   :  { %7047 = vmatprep.mubr.msk.f32.mxu1 %vm10288_vm0, %v12349_v4  ;;  %7152 = vmatprep.mubr.msk.f32.mxu0 %vm10288_vm0, %v12349_v4 }
  0x65   :  { %8888 = vmatpush3.bf16.msra.mxu1 %v10723_v60  ;;  %8960 = vmatpush3.bf16.msra.mxu0 %v10394_v41 }
  0x66   :  { %8889 = vmatprep.subr.bf16.mxu1 %v12373_v1  ;;  %8961 = vmatprep.subr.bf16.mxu0 %v12373_v1 }
  0x69   :  { %8891 = vmatpush3.bf16.msra.mxu1 %v10735_v30  ;;  %8963 = vmatpush3.bf16.msra.mxu0 %v10413_v49 }
  0x6a   :  { %8892 = vmatprep.subr.bf16.mxu1 %v12373_v1  ;;  %8964 = vmatprep.subr.bf16.mxu0 %v12373_v1 }
  0x6d   :  { %8894 = vmatpush3.bf16.msra.mxu1 %v10743_v7  ;;  %8966 = vmatpush3.bf16.msra.mxu0 %v10453_v11 }
  0x6e   :  { %8895 = vmatprep.subr.bf16.mxu1 %v12373_v1  ;;  %8967 = vmatprep.subr.bf16.mxu0 %v12373_v1 }
  0x71   :  { %8897 = vmatpush3.bf16.msra.mxu1 %v10751_v46  ;;  %8969 = vmatpush3.bf16.msra.mxu0 %v10479_v23 }
  0x72   :  { %8898 = vmatprep.subr.bf16.mxu1 %v12373_v1  ;;  %8970 = vmatprep.subr.bf16.mxu0 %v12373_v1 }
  0x75   :  { %8900 = vmatpush3.bf16.msra.mxu1 %v10759_v47  ;;  %8972 = vmatpush3.bf16.msra.mxu0 %v10517_v24 }
  0x76   :  { %8901 = vmatprep.subr.bf16.mxu1 %v12373_v1  ;;  %8973 = vmatprep.subr.bf16.mxu0 %v12373_v1 }
  0x79   :  { %8903 = vmatpush3.bf16.msra.mxu1 %v10767_v54  ;;  %8975 = vmatpush3.bf16.msra.mxu0 %v10534_v51 }
  0x7a   :  { %8904 = vmatprep.subr.bf16.mxu1 %v12373_v1  ;;  %8976 = vmatprep.subr.bf16.mxu0 %v12373_v1 }
  0x7d   :  { %8906 = vmatpush3.bf16.msra.mxu1 %v10775_v55  ;;  %8978 = vmatpush3.bf16.msra.mxu0 %v10558_v57 }
  0x7e   :  { %8979 = vmatprep.subr.bf16.mxu1 %v12373_v1  ;;  %9123 = vmatprep.subr.bf16.mxu0 %v12373_v1 }
  0x80   :  { %7048 = vmatmul.mubr.f32.vlgmr.msra.gmra.mrb[0].mxu1 %v10501_v40  ;;  %7153 = vmatmul.mubr.f32.vlgmr.msra.gmra.mrb[0].mxu0 %v10465_v18  ;;  %v10797_v18 = vand.u32 4294901760, %v777_v36 }
  0x81   :  { %8981 = vmatpush3.bf16.msra.mxu1 %v10385_v37  ;;  %7187 = vmatprep.mubr.msk.f32.mxu1 %vm10288_vm0, %v12349_v4 }
  0x82   :  { %8982 = vmatprep.subr.bf16.mxu1 %v12373_v1  ;;  %7397 = vmatprep.mubr.msk.f32.mxu0 %vm10288_vm0, %v12349_v4  ;;  %v10802_v40 = vsub.f32 %v777_v36, %v10797_v18  ;;  %v1432_v36 = vld [vmem:[%s12344_s1 + $0x38] sm:$0xff] }
  0x83   :  { %9125 = vmatpush3.bf16.msra.mxu0 %v10856_v62 }
  0x84   :  { %v861_v38 = vand.u32 4294901760, %v10802_v40  ;;  %9126 = vmatprep.subr.bf16.mxu0 %v12373_v1 }
  0x85   :  { %8984 = vmatpush3.bf16.msra.mxu1 %v10394_v41 }
  0x86   :  { %8985 = vmatprep.subr.bf16.mxu1 %v12373_v1  ;;  %v862_v44 = vsub.f32 %v10802_v40, %v861_v38 }
  0x87   :  { %9128 = vmatpush3.bf16.msra.mxu0 %v10952_v32 }
  0x88   :  { %v863_v8 = vand.u32 4294901760, %v862_v44  ;;  %9129 = vmatprep.subr.bf16.mxu0 %v12373_v1  ;;  %v1433_v44 = vld [vmem:[%s12344_s1 + $0x40] sm:$0xff] }
  0x89   :  { %8987 = vmatpush3.bf16.msra.mxu1 %v10413_v49  ;;  %v1471_v29 = vand.u32 4294901760, %v1433_v44 }
  0x8a   :  { %8988 = vmatprep.subr.bf16.mxu1 %v12373_v1 }
  0x8b   :  { %9131 = vmatpush3.bf16.msra.mxu0 %v10962_v16 }
  0x8c   :  { %9132 = vmatprep.subr.bf16.mxu0 %v12373_v1 }
  0x8d   :  { %8990 = vmatpush3.bf16.msra.mxu1 %v10453_v11 }
  0x8e   :  { %8991 = vmatprep.subr.bf16.mxu1 %v12373_v1 }
  0x91   :  { %8993 = vmatpush3.bf16.msra.mxu1 %v10479_v23 }
  0x92   :  { %8994 = vmatprep.subr.bf16.mxu1 %v12373_v1 }
  0x95   :  { %8996 = vmatpush3.bf16.msra.mxu1 %v10517_v24 }
  0x96   :  { %8997 = vmatprep.subr.bf16.mxu1 %v12373_v1 }
  0x99   :  { %8999 = vmatpush3.bf16.msra.mxu1 %v10534_v51 }
  0x9a   :  { %9000 = vmatprep.subr.bf16.mxu1 %v12373_v1 }
  0x9d   :  { %9002 = vmatpush3.bf16.msra.mxu1 %v10558_v57 }
  0x9e   :  { %9003 = vmatprep.subr.bf16.mxu1 %v12373_v1 }
  0xa0   :  { %7188 = vmatmul.mubr.f32.vlgmr.msra.gmra.mrb[2].mxu1 %v863_v8  ;;  %v1434_v8 = vld [vmem:[%s12344_s1 + $0x48] sm:$0xff] }
  0xa1   :  { %9005 = vmatpush3.bf16.msra.mxu1 %v10595_v9  ;;  %7222 = vmatprep.mubr.msk.f32.mxu1 %vm10288_vm0, %v12349_v4  ;;  %v1474_v48 = vand.u32 4294901760, %v1434_v8 }
  0xa2   :  { %9006 = vmatprep.subr.bf16.mxu1 %v12373_v1 }
  0xa3   :  { %v10982_v59 = vpack.c.bf16 %v1474_v48, %v1471_v29 }
  0xa5   :  { %9008 = vmatpush3.bf16.msra.mxu1 %v10614_v45 }
  0xa6   :  { %9009 = vmatprep.subr.bf16.mxu1 %v12373_v1 }
  0xa9   :  { %9011 = vmatpush3.bf16.msra.mxu1 %v10634_v19 }
  0xaa   :  { %9012 = vmatprep.subr.bf16.mxu1 %v12373_v1 }
  0xad   :  { %9014 = vmatpush3.bf16.msra.mxu1 %v10651_v61 }
  0xae   :  { %9015 = vmatprep.subr.bf16.mxu1 %v12373_v1 }
  0xb1   :  { %9017 = vmatpush3.bf16.msra.mxu1 %v10671_v33 }
  0xb2   :  { %9018 = vmatprep.subr.bf16.mxu1 %v12373_v1 }
  0xb5   :  { %9020 = vmatpush3.bf16.msra.mxu1 %v10688_v13 }
  0xb6   :  { %9021 = vmatprep.subr.bf16.mxu1 %v12373_v1 }
  0xb9   :  { %9023 = vmatpush3.bf16.msra.mxu1 %v10695_v52 }
  0xba   :  { %9024 = vmatprep.subr.bf16.mxu1 %v12373_v1 }
  0xbd   :  { %9026 = vmatpush3.bf16.msra.mxu1 %v10703_v53 }
  0xbe   :  { %9027 = vmatprep.subr.bf16.mxu1 %v12373_v1 }
  0xc0   :  { %7223 = vmatmul.mubr.f32.vlgmr.msra.gmra.mrb[2].mxu1 %v10797_v18 }
  0xc1   :  { %9029 = vmatpush3.bf16.msra.mxu1 %v10713_v58  ;;  %7257 = vmatprep.mubr.msk.f32.mxu1 %vm10288_vm0, %v12349_v4 }
  0xc2   :  { %9030 = vmatprep.subr.bf16.mxu1 %v12373_v1 }
  0xc5   :  { %9032 = vmatpush3.bf16.msra.mxu1 %v10723_v60 }
  0xc6   :  { %9033 = vmatprep.subr.bf16.mxu1 %v12373_v1 }
  0xc9   :  { %9035 = vmatpush3.bf16.msra.mxu1 %v10735_v30 }
  0xca   :  { %9036 = vmatprep.subr.bf16.mxu1 %v12373_v1 }
  0xcd   :  { %9038 = vmatpush3.bf16.msra.mxu1 %v10743_v7 }
  0xce   :  { %9039 = vmatprep.subr.bf16.mxu1 %v12373_v1 }
  0xd1   :  { %9041 = vmatpush3.bf16.msra.mxu1 %v10751_v46 }
  0xd2   :  { %9042 = vmatprep.subr.bf16.mxu1 %v12373_v1 }
  0xd5   :  { %9044 = vmatpush3.bf16.msra.mxu1 %v10759_v47 }
  0xd6   :  { %9045 = vmatprep.subr.bf16.mxu1 %v12373_v1 }
  0xd9   :  { %9047 = vmatpush3.bf16.msra.mxu1 %v10767_v54 }
  0xda   :  { %9048 = vmatprep.subr.bf16.mxu1 %v12373_v1 }
  0xdd   :  { %9050 = vmatpush3.bf16.msra.mxu1 %v10775_v55  ;;  %v1440_v55 = vld [vmem:[%s12344_s1 + $0x78] sm:$0xff] }
  0xde   :  { %9051 = vmatprep.subr.bf16.mxu1 %v12373_v1 }
  0xe0   :  { %7258 = vmatmul.mubr.f32.vlgmr.msra.gmra.mrb[2].mxu1 %v10802_v40  ;;  %v1468_v40 = vand.u32 4294901760, %v1432_v36 }
  0xe1   :  { %9053 = vmatpush3.bf16.msra.mxu1 %v10385_v37  ;;  %7292 = vmatprep.mubr.msk.f32.mxu1 %vm10288_vm0, %v12349_v4 }
  0xe2   :  { %9054 = vmatprep.subr.bf16.mxu1 %v12373_v1  ;;  %v11018_v47 = vsub.f32 %v1432_v36, %v1468_v40  ;;  %v12378_v36 = vand.u32 4294901760, %v10860_v21 }
  0xe5   :  { %9056 = vmatpush3.bf16.msra.mxu1 %v10394_v41 }
  0xe6   :  { %9057 = vmatprep.subr.bf16.mxu1 %v12373_v1 }
  0xe9   :  { %9059 = vmatpush3.bf16.msra.mxu1 %v10413_v49 }
  0xea   :  { %9060 = vmatprep.subr.bf16.mxu1 %v12373_v1 }
  0xed   :  { %9062 = vmatpush3.bf16.msra.mxu1 %v10453_v11 }
  0xee   :  { %9063 = vmatprep.subr.bf16.mxu1 %v12373_v1 }
  0xf1   :  { %9065 = vmatpush3.bf16.msra.mxu1 %v10479_v23 }
  0xf2   :  { %9066 = vmatprep.subr.bf16.mxu1 %v12373_v1 }
  0xf5   :  { %9068 = vmatpush3.bf16.msra.mxu1 %v10517_v24 }
  0xf6   :  { %9069 = vmatprep.subr.bf16.mxu1 %v12373_v1 }
  0xf9   :  { %9071 = vmatpush3.bf16.msra.mxu1 %v10534_v51 }
  0xfa   :  { %9072 = vmatprep.subr.bf16.mxu1 %v12373_v1 }
  0xfd   :  { %9074 = vmatpush3.bf16.msra.mxu1 %v10558_v57 }
  0xfe   :  { %9075 = vmatprep.subr.bf16.mxu1 %v12373_v1 }
 0x100   :  { %7293 = vmatmul.mubr.f32.vlgmr.msra.gmra.mrb[2].mxu1 %v861_v38 }
 0x101   :  { %9077 = vmatpush3.bf16.msra.mxu1 %v10579_v50  ;;  %7327 = vmatprep.mubr.msk.f32.mxu1 %vm10288_vm0, %v12349_v4  ;;  %v1439_v50 = vld [vmem:[%s12344_s1 + $0x70] sm:$0xff] }
 0x102   :  { %9078 = vmatprep.subr.bf16.mxu1 %v12373_v1 }
 0x105   :  { %9080 = vmatpush3.bf16.msra.mxu1 %v10601_v15  ;;  %v11008_v15 = vsub.f32 %v1430_v17, %v1462_v31  ;;  %v1489_v31 = vand.u32 4294901760, %v1439_v50 }
 0x106   :  { %9081 = vmatprep.subr.bf16.mxu1 %v12373_v1 }
 0x109   :  { %9083 = vmatpush3.bf16.msra.mxu1 %v10623_v28  ;;  %v11006_v28 = vsub.f32 %v1429_v3, %v1459_v26 }
 0x10a   :  { %9084 = vmatprep.subr.bf16.mxu1 %v12373_v1 }
 0x10d   :  { %9086 = vmatpush3.bf16.msra.mxu1 %v10649_v42  ;;  %v11004_v42 = vsub.f32 %v1428_v14, %v1456_v39  ;;  %v11022_v14 = vsub.f32 %v1434_v8, %v1474_v48 }
 0x10e   :  { %9087 = vmatprep.subr.bf16.mxu1 %v12373_v1 }
 0x111   :  { %9089 = vmatpush3.bf16.msra.mxu1 %v10673_v27  ;;  %v11002_v27 = vsub.f32 %v1427_v5, %v1453_v0  ;;  %v11020_v5 = vsub.f32 %v1433_v44, %v1471_v29  ;;  %v11040_v44 = vsub.f32 %v1439_v50, %v1489_v31  ;;  %v12376_v29 = vand.u32 4294901760, %v11004_v42 }
 0x112   :  { %9090 = vmatprep.subr.bf16.mxu1 %v12373_v1 }
 0x113   :  { %v1562_v50 = vsub.f32 %v11004_v42, %v12376_v29  ;;  %v12394_v7 = vand.u32 4294901760, %v11040_v44 }
 0x115   :  { %9092 = vmatpush3.bf16.msra.mxu1 %v10683_v12 }
 0x116   :  { %9093 = vmatprep.subr.bf16.mxu1 %v12373_v1 }
 0x119   :  { %9095 = vmatpush3.bf16.msra.mxu1 %v10697_v6 }
 0x11a   :  { %9096 = vmatprep.subr.bf16.mxu1 %v12373_v1 }
 0x11d   :  { %9098 = vmatpush3.bf16.msra.mxu1 %v10705_v2  ;;  %v1438_v2 = vld [vmem:[%s12344_s1 + $0x68] sm:$0xff] }
 0x11e   :  { %9099 = vmatprep.subr.bf16.mxu1 %v12373_v1  ;;  %v1486_v12 = vand.u32 4294901760, %v1438_v2 }
 0x120   :  { %7328 = vmatmul.mubr.f32.vlgmr.msra.gmra.mrb[2].mxu1 %v10797_v18  ;;  %v11032_v26 = vsub.f32 %v1438_v2, %v1486_v12  ;;  %v12375_v2 = vand.u32 4294901760, %v11002_v27 }
 0x121   :  { %9101 = vmatpush3.bf16.msra.mxu1 %v10385_v37  ;;  %7362 = vmatprep.mubr.msk.f32.mxu1 %vm10288_vm0, %v12349_v4 }
 0x122   :  { %9102 = vmatprep.subr.bf16.mxu1 %v12373_v1 }
 0x125   :  { %9104 = vmatpush3.bf16.msra.mxu1 %v10394_v41 }
 0x126   :  { %9105 = vmatprep.subr.bf16.mxu1 %v12373_v1 }
 0x129   :  { %9107 = vmatpush3.bf16.msra.mxu1 %v10413_v49 }
 0x12a   :  { %9108 = vmatprep.subr.bf16.mxu1 %v12373_v1 }
 0x12d   :  { %9110 = vmatpush3.bf16.msra.mxu1 %v10453_v11 }
 0x12e   :  { %9111 = vmatprep.subr.bf16.mxu1 %v12373_v1 }
 0x131   :  { %9113 = vmatpush3.bf16.msra.mxu1 %v10479_v23 }
 0x132   :  { %9114 = vmatprep.subr.bf16.mxu1 %v12373_v1 }
 0x135   :  { %9116 = vmatpush3.bf16.msra.mxu1 %v10517_v24 }
 0x136   :  { %9117 = vmatprep.subr.bf16.mxu1 %v12373_v1 }
 0x139   :  { %9119 = vmatpush3.bf16.msra.mxu1 %v10534_v51 }
 0x13a   :  { %9120 = vmatprep.subr.bf16.mxu1 %v12373_v1 }
 0x13d   :  { %9122 = vmatpush3.bf16.msra.mxu1 %v10558_v57 }
 0x13e   :  { %9267 = vmatprep.subr.bf16.mxu1 %v12373_v1 }
 0x140   :  { %7363 = vmatmul.mubr.f32.vlgmr.msra.gmra.mrb[2].mxu1 %v10797_v18  ;;  %v1465_v18 = vand.u32 4294901760, %v1431_v35 }
 0x141   :  { %9269 = vmatpush3.bf16.msra.mxu1 %v10385_v37  ;;  %7607 = vmatprep.mubr.msk.f32.mxu1 %vm10288_vm0, %v12349_v4  ;;  %v1437_v4 = vld [vmem:[%s12344_s1 + $0x60] sm:$0xff] }
 0x142   :  { %9270 = vmatprep.subr.bf16.mxu1 %v12373_v1  ;;  %v10972_v38 = vpack.c.bf16 %v1468_v40, %v1465_v18  ;;  %v1483_v6 = vand.u32 4294901760, %v1437_v4  ;;  %v11016_v54 = vsub.f32 %v1431_v35, %v1465_v18  ;;  %v12381_v35 = vand.u32 4294901760, %v10858_v43 }
 0x143   :  { %v12498_v18 = vmov 0.0|0.0  }
 0x144   :  { %9134 = vmatpush3.bf16.msra.mxu0 %v10972_v38  ;;  %v11028_v3 = vpack.c.bf16 %v1486_v12, %v1483_v6  ;;  %v11030_v17 = vsub.f32 %v1437_v4, %v1483_v6  ;;  %v1541_v4 = vsub.f32 %v10858_v43, %v12381_v35  ;;  %v1548_v12 = vsub.f32 %v10860_v21, %v12378_v36 }
 0x145   :  { %9272 = vmatpush3.bf16.msra.mxu1 %v10394_v41  ;;  %9135 = vmatprep.subr.bf16.mxu0 %v12373_v1  ;;  %v12383_v36 = vand.u32 4294901760, %v11020_v5 }
 0x146   :  { %9273 = vmatprep.subr.bf16.mxu1 %v12373_v1  ;;  %v1542_v6 = vand.u32 4294901760, %v1541_v4  ;;  %v1549_v48 = vand.u32 4294901760, %v1548_v12  ;;  %v12391_v46 = vand.u32 4294901760, %v11030_v17 }
 0x148   :  { %9137 = vmatpush3.bf16.msra.mxu0 %v10982_v59 }
 0x149   :  { %9275 = vmatpush3.bf16.msra.mxu1 %v10413_v49  ;;  %9138 = vmatprep.subr.bf16.mxu0 %v12373_v1 }
 0x14a   :  { %9276 = vmatprep.subr.bf16.mxu1 %v12373_v1 }
 0x14d   :  { %9278 = vmatpush3.bf16.msra.mxu1 %v10453_v11 }
 0x14e   :  { %9279 = vmatprep.subr.bf16.mxu1 %v12373_v1 }
 0x151   :  { %9281 = vmatpush3.bf16.msra.mxu1 %v10479_v23 }
 0x152   :  { %9282 = vmatprep.subr.bf16.mxu1 %v12373_v1 }
 0x153   :  { %v478_v22 = vpop.f32.mrb[0].mxu1  ;;  %v773_v20 = vpop.f32.mrb[0].mxu0 }
 0x154   :  { %v10938_v25 = vadd.f32 %v773_v20, %v478_v22  ;;  %v7049_v56 = vpop.f32.mrb[1].mxu1  ;;  %v7154_v63 = vpop.f32.mrb[1].mxu0  ;;  %v1436_v22 = vld [vmem:[%s12344_s1 + $0x58] sm:$0xff]  ;;  %v1477_v20 = vand.u32 4294901760, %v1435_v34 }
 0x155   :  { %9284 = vmatpush3.bf16.msra.mxu1 %v10517_v24  ;;  %v1480_v56 = vand.u32 4294901760, %v1436_v22 }
 0x156   :  { %9285 = vmatprep.subr.bf16.mxu1 %v12373_v1  ;;  %v11024_v0 = vsub.f32 %v1435_v34, %v1477_v20  ;;  %v1421_v53 = vsub.f32 %v10445_v10, %v10938_v25  ;;  %v12500_v10 = vand.u32 4294901760, %v10858_v43 }
 0x157   :  { %v10992_v63 = vpack.c.bf16 %v1480_v56, %v1477_v20  ;;  %v11026_v39 = vsub.f32 %v1436_v22, %v1480_v56  ;;  %v1563_v22 = vand.u32 4294901760, %v1562_v50  ;;  %v12377_v20 = vand.u32 4294901760, %v11006_v28 }
 0x158   :  { %v12379_v56 = vand.u32 4294901760, %v11008_v15  ;;  %v12387_v35 = vand.u32 4294901760, %v11024_v0 }
 0x159   :  { %9287 = vmatpush3.bf16.msra.mxu1 %v10534_v51  ;;  %9140 = vmatpush3.bf16.msra.mxu0 %v10992_v63  ;;  %v1569_v4 = vsub.f32 %v11006_v28, %v12377_v20 }
 0x15a   :  { %9288 = vmatprep.subr.bf16.mxu1 %v12373_v1  ;;  %9141 = vmatprep.subr.bf16.mxu0 %v12373_v1  ;;  %v1576_v12 = vsub.f32 %v11008_v15, %v12379_v56  ;;  %v1597_v56 = vsub.f32 %v11020_v5, %v12383_v36 }
 0x15c   :  { %v1577_v29 = vand.u32 4294901760, %v1576_v12 }
 0x15d   :  { %9290 = vmatpush3.bf16.msra.mxu1 %v10558_v57  ;;  %9143 = vmatpush3.bf16.msra.mxu0 %v11028_v3  ;;  %v12499_v57 = vmov 0.0  }
 0x15e   :  { %9291 = vmatprep.subr.bf16.mxu1 %v12373_v1  ;;  %v1492_v1 = vand.u32 4294901760, %v1440_v55  ;;  %9144 = vmatprep.subr.bf16.mxu0 %v12498_v18 }
 0x160   :  { %v11038_v40 = vpack.c.bf16 %v1492_v1, %v1489_v31  ;;  %v11042_v8 = vsub.f32 %v1440_v55, %v1492_v1  ;;  %v1555_v1 = vsub.f32 %v11002_v27, %v12375_v2  ;;  %v11060_v55 = vpack.c.bf16 %v1549_v48, %v1542_v6 }
 0x161   :  { %v1570_v2 = vand.u32 4294901760, %v1569_v4  ;;  %v12380_v6 = vand.u32 4294901760, %v11016_v54  ;;  %v12382_v48 = vand.u32 4294901760, %v11018_v47  ;;  %v12386_v4 = vand.u32 4294901760, %v11022_v14 }
 0x162   :  { %9146 = vmatpush3.bf16.msra.mxu0 %v11038_v40  ;;  %v1556_v34 = vand.u32 4294901760, %v1555_v1 }
 0x163   :  { %9147 = vmatprep.subr.bf16.mxu0 %v12498_v18  ;;  %v9154_v1 = vpack.c.bf16 %v1577_v29, %v1570_v2  ;;  %v1583_v50 = vsub.f32 %v11016_v54, %v12380_v6  ;;  %v1604_v2 = vsub.f32 %v11022_v14, %v12386_v4  ;;  %v1598_v29 = vand.u32 4294901760, %v1597_v56 }
 0x164   :  { %v11064_v31 = vpack.c.bf16 %v1563_v22, %v1556_v34  ;;  %v1590_v34 = vsub.f32 %v11018_v47, %v12382_v48  ;;  %v1611_v48 = vsub.f32 %v11024_v0, %v12387_v35  ;;  %v12396_v56 = vand.u32 4294901760, %v11032_v26 }
 0x165   :  { %v1584_v22 = vand.u32 4294901760, %v1583_v50  ;;  %v1605_v6 = vand.u32 4294901760, %v1604_v2  ;;  %v12390_v50 = vand.u32 4294901760, %v11026_v39  ;;  %v1625_v4 = vsub.f32 %v11030_v17, %v12391_v46 }
 0x166   :  { %v1591_v20 = vand.u32 4294901760, %v1590_v34 }
 0x167   :  { %v9160_v34 = vpack.c.bf16 %v1605_v6, %v1598_v29  ;;  %v1632_v6 = vsub.f32 %v11032_v26, %v12396_v56  ;;  %v1626_v29 = vand.u32 4294901760, %v1625_v4  ;;  %v9172_v4 = vpack.c.bf16 %v10860_v21, %v10858_v43 }
 0x168   :  { %v9157_v12 = vpack.c.bf16 %v1591_v20, %v1584_v22  ;;  %v1618_v20 = vsub.f32 %v11026_v39, %v12390_v50  ;;  %v1612_v22 = vand.u32 4294901760, %v1611_v48  ;;  %v12395_v48 = vand.u32 4294901760, %v11042_v8 }
 0x169   :  { %v1633_v35 = vand.u32 4294901760, %v1632_v6  ;;  %v1639_v50 = vsub.f32 %v11040_v44, %v12394_v7  ;;  %v9175_v6 = vpack.c.bf16 %v11004_v42, %v11002_v27  ;;  %v9184_v7 = vpack.c.bf16 %v11022_v14, %v11020_v5 }
 0x16a   :  { %v1619_v36 = vand.u32 4294901760, %v1618_v20 }
 0x16b   :  { %v9166_v20 = vpack.c.bf16 %v1633_v35, %v1626_v29  ;;  %v9178_v35 = vpack.c.bf16 %v11008_v15, %v11006_v28  ;;  %v9181_v29 = vpack.c.bf16 %v11018_v47, %v11016_v54 }
 0x16c   :  { %v9163_v2 = vpack.c.bf16 %v1619_v36, %v1612_v22  ;;  %v1646_v36 = vsub.f32 %v11042_v8, %v12395_v48  ;;  %v1640_v22 = vand.u32 4294901760, %v1639_v50  ;;  %v9187_v50 = vpack.c.bf16 %v11026_v39, %v11024_v0 }
 0x16e   :  { %v1647_v46 = vand.u32 4294901760, %v1646_v36  ;;  %v9193_v36 = vpack.c.bf16 %v11042_v8, %v11040_v44 }
 0x170   :  { %v9169_v30 = vpack.c.bf16 %v1647_v46, %v1640_v22  ;;  %v9190_v46 = vpack.c.bf16 %v11032_v26, %v11030_v17  ;;  %v1419_v22 = vmul.f32 %v10938_v25, %v10938_v25 }
 0x213   :  { %v1415_v48 = vpop.f32.mrb[2].mxu1 }
 0x214   :  { %v1420_v56 = vsub.f32 %v1415_v48, %v1419_v22  ;;  %v7364_v60 = vpop.f32.mrb[3].mxu1  ;;  %v12521_v48 = vld [vmem:[#allocation18_spill] sm:$0xff]  ;;  %v12526_v22 = vld [vmem:[#allocation27_spill] sm:$0xff] }
 0x216   :  { %v1422_v58 = vadd.f32 1e-05, %v1420_v56  ;;  %v12519_v56 = vld [vmem:[#allocation15_spill] sm:$0xff] }
 0x218   :  { %10230 = vrsqrt.f32 %v1422_v58  ;;  %v12505_v58 = vand.u32 4294901760, %v11008_v15  ;;  %v12510_v15 = vand.u32 4294901760, %v11024_v0 }
 0x222   :  { %v10231_v52 = vpop.eup %10230 }
 0x223   :  { %v1424_v13 = vmul.f32 %v10231_v52, %v1421_v53  ;;  %v12504_v53 = vand.u32 4294901760, %v11006_v28  ;;  %v12511_v28 = vand.u32 4294901760, %v11026_v39 }
 0x225   :  { %v11132_v33 = vand.u32 4294901760, %v1424_v13  ;;  %v9226_v60 = vpack.c.bf16 %v12505_v58, %v12504_v53  ;;  %v12531_v53 = vld [vmem:[#allocation32_spill] sm:$0xff]  ;;  %v12532_v58 = vld [vmem:[#allocation33_spill] sm:$0xff] }
 0x227   :  { %v1528_v61 = vsub.f32 %v1424_v13, %v11132_v33  ;;  %v12503_v13 = vand.u32 4294901760, %v11004_v42 }
 0x229   :  { %v1529_v19 = vand.u32 4294901760, %v1528_v61 }
 0x22b   :  { %v1530_v45 = vsub.f32 %v1528_v61, %v1529_v19 }
 0x22d   :  { %v1531_v9 = vand.u32 4294901760, %v1530_v45 }
 0x22f   :  { %7398 = vmatmul.mubr.f32.vlgmr.msra.gmra.mrb[2].mxu0 %v1531_v9  ;;  %v12501_v9 = vand.u32 4294901760, %v10860_v21  ;;  %v9235_v21 = vpack.c.bf16 %v12511_v28, %v12510_v15  ;;  %v12540_v15 = vld [vmem:[#allocation25_spill] sm:$0xff] }
 0x230   :  { %9149 = vmatpush3.bf16.msra.mxu0 %v11060_v55  ;;  %7432 = vmatprep.mubr.msk.f32.mxu0 %vm10288_vm0, %v12499_v57 }
 0x231   :  { %9150 = vmatprep.subr.bf16.mxu0 %v12498_v18  ;;  %v9220_v45 = vpack.c.bf16 %v12501_v9, %v12500_v10 }
 0x234   :  { %9152 = vmatpush3.bf16.msra.mxu0 %v11064_v31 }
 0x235   :  { %9153 = vmatprep.subr.bf16.mxu0 %v12498_v18 }
 0x238   :  { %9155 = vmatpush3.bf16.msra.mxu0 %v9154_v1 }
 0x239   :  { %9156 = vmatprep.subr.bf16.mxu0 %v12498_v18 }
 0x23c   :  { %9158 = vmatpush3.bf16.msra.mxu0 %v9157_v12  ;;  %v12517_v12 = vld [vmem:[#allocation11_spill] sm:$0xff] }
 0x23d   :  { %9159 = vmatprep.subr.bf16.mxu0 %v12498_v18 }
 0x240   :  { %9161 = vmatpush3.bf16.msra.mxu0 %v9160_v34  ;;  %v12518_v34 = vld [vmem:[#allocation13_spill] sm:$0xff] }
 0x241   :  { %9162 = vmatprep.subr.bf16.mxu0 %v12498_v18 }
 0x244   :  { %9164 = vmatpush3.bf16.msra.mxu0 %v9163_v2  ;;  %v12520_v2 = vld [vmem:[#allocation17_spill] sm:$0xff] }
 0x245   :  { %9165 = vmatprep.subr.bf16.mxu0 %v12498_v18 }
 0x248   :  { %9167 = vmatpush3.bf16.msra.mxu0 %v9166_v20  ;;  %v12522_v20 = vld [vmem:[#allocation21_spill] sm:$0xff] }
 0x249   :  { %9168 = vmatprep.subr.bf16.mxu0 %v12498_v18 }
 0x24c   :  { %9170 = vmatpush3.bf16.msra.mxu0 %v9169_v30  ;;  %v12508_v30 = vand.u32 4294901760, %v11020_v5  ;;  %v12514_v5 = vand.u32 4294901760, %v11040_v44 }
 0x24d   :  { %9171 = vmatprep.subr.bf16.mxu0 %v12498_v18 }
 0x24f   :  { %7433 = vmatmul.mubr.f32.vlgmr.msra.gmra.mrb[2].mxu0 %v11132_v33 }
 0x250   :  { %9173 = vmatpush3.bf16.msra.mxu0 %v9172_v4  ;;  %7467 = vmatprep.mubr.msk.f32.mxu0 %vm10288_vm0, %v12499_v57  ;;  %v12523_v4 = vld [vmem:[#allocation22_spill] sm:$0xff] }
 0x251   :  { %9174 = vmatprep.subr.bf16.mxu0 %v12498_v18 }
 0x254   :  { %9176 = vmatpush3.bf16.msra.mxu0 %v9175_v6  ;;  %v12524_v6 = vld [vmem:[#allocation24_spill] sm:$0xff] }
 0x255   :  { %9177 = vmatprep.subr.bf16.mxu0 %v12498_v18 }
 0x258   :  { %9179 = vmatpush3.bf16.msra.mxu0 %v9178_v35  ;;  %v12525_v35 = vld [vmem:[#allocation26_spill] sm:$0xff] }
 0x259   :  { %9180 = vmatprep.subr.bf16.mxu0 %v12498_v18 }
 0x25c   :  { %9182 = vmatpush3.bf16.msra.mxu0 %v9181_v29  ;;  %v11325_v29 = vld [vmem:[#allocation2] sm:$0xff] }
 0x25d   :  { %9183 = vmatprep.subr.bf16.mxu0 %v12498_v18 }
 0x260   :  { %9185 = vmatpush3.bf16.msra.mxu0 %v9184_v7  ;;  %v12509_v7 = vand.u32 4294901760, %v11022_v14  ;;  %v12515_v14 = vand.u32 4294901760, %v11042_v8 }
 0x261   :  { %9186 = vmatprep.subr.bf16.mxu0 %v12498_v18 }
 0x262   :  { %v9232_v43 = vpack.c.bf16 %v12509_v7, %v12508_v30  ;;  %v9241_v55 = vpack.c.bf16 %v12515_v14, %v12514_v5  ;;  %v12537_v30 = vld [vmem:[#allocation19_spill] sm:$0xff]  ;;  %v12538_v7 = vld [vmem:[#allocation20_spill] sm:$0xff] }
 0x263   :  { %v3381_v14 = vld [vmem:[#allocation2 + $0x20] sm:$0xff] }
 0x264   :  { %9188 = vmatpush3.bf16.msra.mxu0 %v9187_v50  ;;  %v11327_v50 = vld [vmem:[#allocation2 + $0x8] sm:$0xff] }
 0x265   :  { %9189 = vmatprep.subr.bf16.mxu0 %v12498_v18 }
 0x268   :  { %9191 = vmatpush3.bf16.msra.mxu0 %v9190_v46  ;;  %v3399_v46 = vand.u32 4294901760, %v11325_v29 }
 0x269   :  { %9192 = vmatprep.subr.bf16.mxu0 %v12498_v18 }
 0x26a   :  { %v11339_v10 = vsub.f32 %v11325_v29, %v3399_v46 }
 0x26c   :  { %9194 = vmatpush3.bf16.msra.mxu0 %v9193_v36  ;;  %v3402_v36 = vand.u32 4294901760, %v11327_v50 }
 0x26d   :  { %9195 = vmatprep.subr.bf16.mxu0 %v12498_v18 }
 0x26e   :  { %v11344_v9 = vsub.f32 %v11327_v50, %v3402_v36  ;;  %v11490_v28 = vpack.c.bf16 %v3402_v36, %v3399_v46  ;;  %v3389_v36 = vld [vmem:[#allocation2 + $0x60] sm:$0xff] }
 0x26f   :  { %7468 = vmatmul.mubr.f32.vlgmr.msra.gmra.mrb[2].mxu0 %v1528_v61  ;;  %v12502_v61 = vand.u32 4294901760, %v11002_v27  ;;  %v12507_v27 = vand.u32 4294901760, %v11018_v47  ;;  %v12512_v47 = vand.u32 4294901760, %v11030_v17 }
 0x270   :  { %9197 = vmatpush3.bf16.msra.mxu0 %v10856_v62  ;;  %7502 = vmatprep.mubr.msk.f32.mxu0 %vm10288_vm0, %v12499_v57 }
 0x271   :  { %9198 = vmatprep.subr.bf16.mxu0 %v12498_v18  ;;  %v9223_v52 = vpack.c.bf16 %v12503_v13, %v12502_v61  ;;  %v12528_v61 = vld [vmem:[#allocation29_spill] sm:$0xff]  ;;  %v12529_v13 = vld [vmem:[#allocation30_spill] sm:$0xff] }
 0x274   :  { %9200 = vmatpush3.bf16.msra.mxu0 %v10952_v32 }
 0x275   :  { %9201 = vmatprep.subr.bf16.mxu0 %v12498_v18 }
 0x278   :  { %9203 = vmatpush3.bf16.msra.mxu0 %v10962_v16 }
 0x279   :  { %9204 = vmatprep.subr.bf16.mxu0 %v12498_v18 }
 0x27c   :  { %9206 = vmatpush3.bf16.msra.mxu0 %v10972_v38 }
 0x27d   :  { %9207 = vmatprep.subr.bf16.mxu0 %v12498_v18 }
 0x280   :  { %9209 = vmatpush3.bf16.msra.mxu0 %v10982_v59 }
 0x281   :  { %9210 = vmatprep.subr.bf16.mxu0 %v12498_v18 }
 0x284   :  { %9212 = vmatpush3.bf16.msra.mxu0 %v10992_v63 }
 0x285   :  { %9213 = vmatprep.subr.bf16.mxu0 %v12498_v18 }
 0x288   :  { %9215 = vmatpush3.bf16.msra.mxu0 %v11028_v3 }
 0x289   :  { %9216 = vmatprep.subr.bf16.mxu0 %v12498_v18 }
 0x28c   :  { %9218 = vmatpush3.bf16.msra.mxu0 %v11038_v40 }
 0x28d   :  { %9219 = vmatprep.subr.bf16.mxu0 %v12498_v18 }
 0x28f   :  { %7503 = vmatmul.mubr.f32.vlgmr.msra.gmra.mrb[2].mxu0 %v1529_v19  ;;  %v12506_v19 = vand.u32 4294901760, %v11016_v54  ;;  %v12513_v54 = vand.u32 4294901760, %v11032_v26 }
 0x290   :  { %9221 = vmatpush3.bf16.msra.mxu0 %v9220_v45  ;;  %7537 = vmatprep.mubr.msk.f32.mxu0 %vm10288_vm0, %v12499_v57  ;;  %v12527_v45 = vld [vmem:[#allocation28_spill] sm:$0xff] }
 0x291   :  { %9222 = vmatprep.subr.bf16.mxu0 %v12498_v18  ;;  %v9229_v42 = vpack.c.bf16 %v12507_v27, %v12506_v19  ;;  %v9238_v25 = vpack.c.bf16 %v12513_v54, %v12512_v47  ;;  %v12534_v19 = vld [vmem:[#allocation12_spill] sm:$0xff]  ;;  %v12535_v27 = vld [vmem:[#allocation14_spill] sm:$0xff] }
 0x292   :  { %v3380_v47 = vld [vmem:[#allocation2 + $0x18] sm:$0xff] }
 0x294   :  { %9224 = vmatpush3.bf16.msra.mxu0 %v9223_v52  ;;  %v12530_v52 = vld [vmem:[#allocation31_spill] sm:$0xff] }
 0x295   :  { %9225 = vmatprep.subr.bf16.mxu0 %v12498_v18 }
 0x298   :  { %9227 = vmatpush3.bf16.msra.mxu0 %v9226_v60  ;;  %v12533_v60 = vld [vmem:[#allocation10_spill] sm:$0xff] }
 0x299   :  { %9228 = vmatprep.subr.bf16.mxu0 %v12498_v18 }
 0x29c   :  { %9230 = vmatpush3.bf16.msra.mxu0 %v9229_v42  ;;  %v12536_v42 = vld [vmem:[#allocation16_spill] sm:$0xff] }
 0x29d   :  { %9231 = vmatprep.subr.bf16.mxu0 %v12498_v18 }
 0x2a0   :  { %9233 = vmatpush3.bf16.msra.mxu0 %v9232_v43  ;;  %v12539_v43 = vld [vmem:[#allocation23_spill] sm:$0xff] }
 0x2a1   :  { %9234 = vmatprep.subr.bf16.mxu0 %v12498_v18 }
 0x2a4   :  { %9236 = vmatpush3.bf16.msra.mxu0 %v9235_v21  ;;  %v3379_v21 = vld [vmem:[#allocation2 + $0x10] sm:$0xff] }
 0x2a5   :  { %9237 = vmatprep.subr.bf16.mxu0 %v12498_v18  ;;  %v3405_v54 = vand.u32 4294901760, %v3379_v21 }
 0x2a8   :  { %9239 = vmatpush3.bf16.msra.mxu0 %v9238_v25  ;;  %v3408_v25 = vand.u32 4294901760, %v3380_v47 }
 0x2a9   :  { %9240 = vmatprep.subr.bf16.mxu0 %v12498_v18 }
 0x2aa   :  { %v11519_v5 = vpack.c.bf16 %v3408_v25, %v3405_v54 }
 0x2ac   :  { %9242 = vmatpush3.bf16.msra.mxu0 %v9241_v55  ;;  %v3382_v55 = vld [vmem:[#allocation2 + $0x28] sm:$0xff] }
 0x2ad   :  { %9243 = vmatprep.subr.bf16.mxu0 %v12498_v18 }
 0x2af   :  { %7538 = vmatmul.mubr.f32.vlgmr.msra.gmra.mrb[2].mxu0 %v11132_v33 }
 0x2b0   :  { %9245 = vmatpush3.bf16.msra.mxu0 %v10856_v62  ;;  %7572 = vmatprep.mubr.msk.f32.mxu0 %vm10288_vm0, %v12499_v57  ;;  %v6024_v62 = vld [vmem:[%s12347_s4] ss:$0 sm:$0xff] }
 0x2b1   :  { %9246 = vmatprep.subr.bf16.mxu0 %v12498_v18 }
 0x2b4   :  { %9248 = vmatpush3.bf16.msra.mxu0 %v10952_v32 }
 0x2b5   :  { %9249 = vmatprep.subr.bf16.mxu0 %v12498_v18 }
 0x2b8   :  { %9251 = vmatpush3.bf16.msra.mxu0 %v10962_v16 }
 0x2b9   :  { %9252 = vmatprep.subr.bf16.mxu0 %v12498_v18 }
 0x2bc   :  { %9254 = vmatpush3.bf16.msra.mxu0 %v10972_v38 }
 0x2bd   :  { %9255 = vmatprep.subr.bf16.mxu0 %v12498_v18 }
 0x2c0   :  { %9257 = vmatpush3.bf16.msra.mxu0 %v10982_v59 }
 0x2c1   :  { %9258 = vmatprep.subr.bf16.mxu0 %v12498_v18 }
 0x2c4   :  { %9260 = vmatpush3.bf16.msra.mxu0 %v10992_v63 }
 0x2c5   :  { %9261 = vmatprep.subr.bf16.mxu0 %v12498_v18 }
 0x2c8   :  { %9263 = vmatpush3.bf16.msra.mxu0 %v11028_v3 }
 0x2c9   :  { %9264 = vmatprep.subr.bf16.mxu0 %v12498_v18 }
 0x2cc   :  { %9266 = vmatpush3.bf16.msra.mxu0 %v11038_v40 }
 0x2cd   :  { %9411 = vmatprep.subr.bf16.mxu0 %v12498_v18 }
 0x2cf   :  { %7573 = vmatmul.mubr.f32.vlgmr.msra.gmra.mrb[2].mxu0 %v11132_v33  ;;  %v12516_v33 = vld [vmem:[#allocation9_spill] sm:$0xff] }
 0x2d0   :  { %9413 = vmatpush3.bf16.msra.mxu0 %v10385_v37  ;;  %7817 = vmatprep.mubr.msk.f32.mxu0 %vm10288_vm0, %v12499_v57 }
 0x2d1   :  { %9414 = vmatprep.subr.bf16.mxu0 %v12498_v18 }
 0x2d4   :  { %9416 = vmatpush3.bf16.msra.mxu0 %v10394_v41 }
 0x2d5   :  { %9417 = vmatprep.subr.bf16.mxu0 %v12498_v18 }
 0x2d8   :  { %9419 = vmatpush3.bf16.msra.mxu0 %v10413_v49 }
 0x2d9   :  { %9420 = vmatprep.subr.bf16.mxu0 %v12498_v18 }
 0x2dc   :  { %9422 = vmatpush3.bf16.msra.mxu0 %v10453_v11 }
 0x2dd   :  { %9423 = vmatprep.subr.bf16.mxu0 %v12498_v18 }
 0x2e0   :  { %9425 = vmatpush3.bf16.msra.mxu0 %v10479_v23 }
 0x2e1   :  { %9426 = vmatprep.subr.bf16.mxu0 %v12498_v18 }
 0x2e4   :  { %9428 = vmatpush3.bf16.msra.mxu0 %v10517_v24 }
 0x2e5   :  { %9429 = vmatprep.subr.bf16.mxu0 %v12498_v18 }
 0x2e8   :  { %9431 = vmatpush3.bf16.msra.mxu0 %v10534_v51 }
 0x2e9   :  { %9432 = vmatprep.subr.bf16.mxu0 %v12498_v18 }
 0x2ec   :  { %9434 = vmatpush3.bf16.msra.mxu0 %v12516_v33 }
 0x2ed   :  { %9435 = vmatprep.subr.bf16.mxu0 %v12498_v18 }
 0x3a2   :  { %v2083_v32 = vpop.f32.mrb[2].mxu0 }
 0x3a3   :  { %v10132_v16 = vadd.f32 %v6024_v62, %v2083_v32  ;;  %v7574_v38 = vpop.f32.mrb[3].mxu0  ;;  %v3411_v62 = vand.u32 4294901760, %v3381_v14  ;;  %v3414_v32 = vand.u32 4294901760, %v3382_v55 }
 0x3a4   :  { %v3383_v38 = vld [vmem:[#allocation2 + $0x30] sm:$0xff] }
 0x3a5   :  { %v11259_v59 = vmax.f32 %v10132_v16, 0.0  ;;  %v11523_v16 = vpack.c.bf16 %v3414_v32, %v3411_v62 }
 0x3a7   :  { %v11262_v63 = vand.u32 4294901760, %v11259_v59  ;;  %v2729_v0 = vmul.f32 %v11259_v59, %v11259_v59 }
 0x3a9   :  { %v11268_v39 = vsub.f32 %v11259_v59, %v11262_v63  ;;  %v11270_v3 = vand.u32 4294901760, %v2729_v0 }
 0x3ab   :  { %v11273_v17 = vsub.f32 %v2729_v0, %v11270_v3  ;;  %v2171_v26 = vand.u32 4294901760, %v11268_v39  ;;  %v3417_v0 = vand.u32 4294901760, %v3383_v38 }
 0x3ad   :  { %v2172_v40 = vsub.f32 %v11268_v39, %v2171_v26  ;;  %v2813_v44 = vand.u32 4294901760, %v11273_v17 }
 0x3af   :  { %v2173_v8 = vand.u32 4294901760, %v2172_v40  ;;  %v2814_v31 = vsub.f32 %v11273_v17, %v2813_v44 }
 0x3b1   :  { %7608 = vmatmul.mubr.f32.vlgmr.msra.gmra.mrb[4].mxu1 %v2173_v8  ;;  %v2815_v1 = vand.u32 4294901760, %v2814_v31  ;;  %v3387_v31 = vld [vmem:[#allocation2 + $0x50] sm:$0xff] }
 0x3b2   :  { %9293 = vmatpush3.bf16.msra.mxu1 %v12517_v12  ;;  %7642 = vmatprep.mubr.msk.f32.mxu1 %vm10288_vm0, %v12499_v57  ;;  %v3429_v29 = vand.u32 4294901760, %v3387_v31 }
 0x3b3   :  { %7818 = vmatmul.mubr.f32.vlgmr.msra.gmra.mrb[4].mxu0 %v2815_v1  ;;  %9294 = vmatprep.subr.bf16.mxu1 %v12498_v18  ;;  %v3388_v1 = vld [vmem:[#allocation2 + $0x58] sm:$0xff] }
 0x3b4   :  { %9437 = vmatpush3.bf16.msra.mxu0 %v12517_v12  ;;  %7852 = vmatprep.mubr.msk.f32.mxu0 %vm10288_vm0, %v12499_v57  ;;  %v3432_v50 = vand.u32 4294901760, %v3388_v1 }
 0x3b5   :  { %9438 = vmatprep.subr.bf16.mxu0 %v12498_v18 }
 0x3b6   :  { %9296 = vmatpush3.bf16.msra.mxu1 %v12518_v34  ;;  %v11535_v46 = vpack.c.bf16 %v3432_v50, %v3429_v29 }
 0x3b7   :  { %9297 = vmatprep.subr.bf16.mxu1 %v12498_v18 }
 0x3b8   :  { %9440 = vmatpush3.bf16.msra.mxu0 %v12518_v34 }
 0x3b9   :  { %9441 = vmatprep.subr.bf16.mxu0 %v12498_v18 }
 0x3ba   :  { %9299 = vmatpush3.bf16.msra.mxu1 %v12519_v56 }
 0x3bb   :  { %9300 = vmatprep.subr.bf16.mxu1 %v12498_v18 }
 0x3bc   :  { %9443 = vmatpush3.bf16.msra.mxu0 %v12519_v56 }
 0x3bd   :  { %9444 = vmatprep.subr.bf16.mxu0 %v12498_v18 }
 0x3be   :  { %9302 = vmatpush3.bf16.msra.mxu1 %v12520_v2 }
 0x3bf   :  { %9303 = vmatprep.subr.bf16.mxu1 %v12498_v18 }
 0x3c0   :  { %9446 = vmatpush3.bf16.msra.mxu0 %v12520_v2 }
 0x3c1   :  { %9447 = vmatprep.subr.bf16.mxu0 %v12498_v18 }
 0x3c2   :  { %9305 = vmatpush3.bf16.msra.mxu1 %v12521_v48 }
 0x3c3   :  { %9306 = vmatprep.subr.bf16.mxu1 %v12498_v18 }
 0x3c4   :  { %9449 = vmatpush3.bf16.msra.mxu0 %v12521_v48 }
 0x3c5   :  { %9450 = vmatprep.subr.bf16.mxu0 %v12498_v18 }
 0x3c6   :  { %9308 = vmatpush3.bf16.msra.mxu1 %v12522_v20 }
 0x3c7   :  { %9309 = vmatprep.subr.bf16.mxu1 %v12498_v18 }
 0x3c8   :  { %9452 = vmatpush3.bf16.msra.mxu0 %v12522_v20 }
 0x3c9   :  { %9453 = vmatprep.subr.bf16.mxu0 %v12498_v18 }
 0x3ca   :  { %9311 = vmatpush3.bf16.msra.mxu1 %v12523_v4 }
 0x3cb   :  { %9312 = vmatprep.subr.bf16.mxu1 %v12498_v18 }
 0x3cc   :  { %9455 = vmatpush3.bf16.msra.mxu0 %v12523_v4 }
 0x3cd   :  { %9456 = vmatprep.subr.bf16.mxu0 %v12498_v18 }
 0x3ce   :  { %9314 = vmatpush3.bf16.msra.mxu1 %v12524_v6 }
 0x3cf   :  { %9315 = vmatprep.subr.bf16.mxu1 %v12498_v18 }
 0x3d0   :  { %9458 = vmatpush3.bf16.msra.mxu0 %v12524_v6 }
 0x3d1   :  { %7643 = vmatmul.mubr.f32.vlgmr.msra.gmra.mrb[4].mxu1 %v11262_v63  ;;  %9459 = vmatprep.subr.bf16.mxu0 %v12498_v18 }
 0x3d2   :  { %9317 = vmatpush3.bf16.msra.mxu1 %v12525_v35  ;;  %7677 = vmatprep.mubr.msk.f32.mxu1 %vm10288_vm0, %v12499_v57 }
 0x3d3   :  { %7853 = vmatmul.mubr.f32.vlgmr.msra.gmra.mrb[4].mxu0 %v11270_v3  ;;  %9318 = vmatprep.subr.bf16.mxu1 %v12498_v18 }
 0x3d4   :  { %9461 = vmatpush3.bf16.msra.mxu0 %v12525_v35  ;;  %7887 = vmatprep.mubr.msk.f32.mxu0 %vm10288_vm0, %v12499_v57 }
 0x3d5   :  { %9462 = vmatprep.subr.bf16.mxu0 %v12498_v18 }
 0x3d6   :  { %9320 = vmatpush3.bf16.msra.mxu1 %v12526_v22 }
 0x3d7   :  { %9321 = vmatprep.subr.bf16.mxu1 %v12498_v18 }
 0x3d8   :  { %9464 = vmatpush3.bf16.msra.mxu0 %v12526_v22 }
 0x3d9   :  { %9465 = vmatprep.subr.bf16.mxu0 %v12498_v18 }
 0x3da   :  { %9323 = vmatpush3.bf16.msra.mxu1 %v12527_v45 }
 0x3db   :  { %9324 = vmatprep.subr.bf16.mxu1 %v12498_v18 }
 0x3dc   :  { %9467 = vmatpush3.bf16.msra.mxu0 %v12527_v45  ;;  %v11555_v45 = vsub.f32 %v3387_v31, %v3429_v29 }
 0x3dd   :  { %9468 = vmatprep.subr.bf16.mxu0 %v12498_v18 }
 0x3de   :  { %9326 = vmatpush3.bf16.msra.mxu1 %v12528_v61 }
 0x3df   :  { %9327 = vmatprep.subr.bf16.mxu1 %v12498_v18 }
 0x3e0   :  { %9470 = vmatpush3.bf16.msra.mxu0 %v12528_v61 }
 0x3e1   :  { %9471 = vmatprep.subr.bf16.mxu0 %v12498_v18 }
 0x3e2   :  { %9329 = vmatpush3.bf16.msra.mxu1 %v12529_v13 }
 0x3e3   :  { %9330 = vmatprep.subr.bf16.mxu1 %v12498_v18 }
 0x3e4   :  { %9473 = vmatpush3.bf16.msra.mxu0 %v12529_v13 }
 0x3e5   :  { %9474 = vmatprep.subr.bf16.mxu0 %v12498_v18 }
 0x3e6   :  { %9332 = vmatpush3.bf16.msra.mxu1 %v12530_v52 }
 0x3e7   :  { %9333 = vmatprep.subr.bf16.mxu1 %v12498_v18 }
 0x3e8   :  { %9476 = vmatpush3.bf16.msra.mxu0 %v12530_v52 }
 0x3e9   :  { %9477 = vmatprep.subr.bf16.mxu0 %v12498_v18 }
 0x3ea   :  { %9335 = vmatpush3.bf16.msra.mxu1 %v12531_v53 }
 0x3eb   :  { %9336 = vmatprep.subr.bf16.mxu1 %v12498_v18 }
 0x3ec   :  { %9479 = vmatpush3.bf16.msra.mxu0 %v12531_v53  ;;  %v11547_v53 = vsub.f32 %v3383_v38, %v3417_v0 }
 0x3ed   :  { %9480 = vmatprep.subr.bf16.mxu0 %v12498_v18 }
 0x3ee   :  { %9338 = vmatpush3.bf16.msra.mxu1 %v12532_v58 }
 0x3ef   :  { %9339 = vmatprep.subr.bf16.mxu1 %v12498_v18 }
 0x3f0   :  { %9482 = vmatpush3.bf16.msra.mxu0 %v12532_v58  ;;  %v3392_v58 = vld [vmem:[#allocation2 + $0x78] sm:$0xff] }
 0x3f1   :  { %7678 = vmatmul.mubr.f32.vlgmr.msra.gmra.mrb[4].mxu1 %v11268_v39  ;;  %9483 = vmatprep.subr.bf16.mxu0 %v12498_v18 }
 0x3f2   :  { %9341 = vmatpush3.bf16.msra.mxu1 %v10385_v37  ;;  %7712 = vmatprep.mubr.msk.f32.mxu1 %vm10288_vm0, %v12499_v57 }
 0x3f3   :  { %7888 = vmatmul.mubr.f32.vlgmr.msra.gmra.mrb[4].mxu0 %v11273_v17  ;;  %9342 = vmatprep.subr.bf16.mxu1 %v12498_v18  ;;  %v3385_v17 = vld [vmem:[#allocation2 + $0x40] sm:$0xff] }
 0x3f4   :  { %9485 = vmatpush3.bf16.msra.mxu0 %v10385_v37  ;;  %7922 = vmatprep.mubr.msk.f32.mxu0 %vm10288_vm0, %v12499_v57  ;;  %v3423_v40 = vand.u32 4294901760, %v3385_v17 }
 0x3f5   :  { %9486 = vmatprep.subr.bf16.mxu0 %v12498_v18 }
 0x3f6   :  { %9344 = vmatpush3.bf16.msra.mxu1 %v10394_v41  ;;  %v11551_v13 = vsub.f32 %v3385_v17, %v3423_v40 }
 0x3f7   :  { %9345 = vmatprep.subr.bf16.mxu1 %v12498_v18 }
 0x3f8   :  { %9488 = vmatpush3.bf16.msra.mxu0 %v10394_v41 }
 0x3f9   :  { %9489 = vmatprep.subr.bf16.mxu0 %v12498_v18 }
 0x3fa   :  { %9347 = vmatpush3.bf16.msra.mxu1 %v10413_v49 }
 0x3fb   :  { %9348 = vmatprep.subr.bf16.mxu1 %v12498_v18 }
 0x3fc   :  { %9491 = vmatpush3.bf16.msra.mxu0 %v10413_v49 }
 0x3fd   :  { %9492 = vmatprep.subr.bf16.mxu0 %v12498_v18 }
 0x3fe   :  { %9350 = vmatpush3.bf16.msra.mxu1 %v10453_v11 }
 0x3ff   :  { %9351 = vmatprep.subr.bf16.mxu1 %v12498_v18 }
 0x400   :  { %9494 = vmatpush3.bf16.msra.mxu0 %v10453_v11 }
 0x401   :  { %9495 = vmatprep.subr.bf16.mxu0 %v12498_v18 }
 0x402   :  { %9353 = vmatpush3.bf16.msra.mxu1 %v10479_v23 }
 0x403   :  { %9354 = vmatprep.subr.bf16.mxu1 %v12498_v18 }
 0x404   :  { %9497 = vmatpush3.bf16.msra.mxu0 %v10479_v23 }
 0x405   :  { %9498 = vmatprep.subr.bf16.mxu0 %v12498_v18 }
 0x406   :  { %9356 = vmatpush3.bf16.msra.mxu1 %v10517_v24 }
 0x407   :  { %9357 = vmatprep.subr.bf16.mxu1 %v12498_v18 }
 0x408   :  { %9500 = vmatpush3.bf16.msra.mxu0 %v10517_v24 }
 0x409   :  { %9501 = vmatprep.subr.bf16.mxu0 %v12498_v18 }
 0x40a   :  { %9359 = vmatpush3.bf16.msra.mxu1 %v10534_v51 }
 0x40b   :  { %9360 = vmatprep.subr.bf16.mxu1 %v12498_v18 }
 0x40c   :  { %9503 = vmatpush3.bf16.msra.mxu0 %v10534_v51 }
 0x40d   :  { %9504 = vmatprep.subr.bf16.mxu0 %v12498_v18 }
 0x40e   :  { %9362 = vmatpush3.bf16.msra.mxu1 %v12516_v33 }
 0x40f   :  { %9363 = vmatprep.subr.bf16.mxu1 %v12498_v18 }
 0x410   :  { %9506 = vmatpush3.bf16.msra.mxu0 %v12516_v33 }
 0x411   :  { %7713 = vmatmul.mubr.f32.vlgmr.msra.gmra.mrb[4].mxu1 %v2171_v26  ;;  %9507 = vmatprep.subr.bf16.mxu0 %v12498_v18  ;;  %v3386_v26 = vld [vmem:[#allocation2 + $0x48] sm:$0xff] }
 0x412   :  { %9365 = vmatpush3.bf16.msra.mxu1 %v12533_v60  ;;  %7747 = vmatprep.mubr.msk.f32.mxu1 %vm10288_vm0, %v12499_v57 }
 0x413   :  { %7923 = vmatmul.mubr.f32.vlgmr.msra.gmra.mrb[4].mxu0 %v2813_v44  ;;  %9366 = vmatprep.subr.bf16.mxu1 %v12498_v18  ;;  %v3426_v44 = vand.u32 4294901760, %v3386_v26 }
 0x414   :  { %9509 = vmatpush3.bf16.msra.mxu0 %v12533_v60  ;;  %7957 = vmatprep.mubr.msk.f32.mxu0 %vm10288_vm0, %v12499_v57  ;;  %v3391_v60 = vld [vmem:[#allocation2 + $0x70] sm:$0xff] }
 0x415   :  { %9510 = vmatprep.subr.bf16.mxu0 %v12498_v18  ;;  %v11531_v8 = vpack.c.bf16 %v3426_v44, %v3423_v40  ;;  %v11553_v61 = vsub.f32 %v3386_v26, %v3426_v44 }
 0x416   :  { %9368 = vmatpush3.bf16.msra.mxu1 %v12534_v19 }
 0x417   :  { %9369 = vmatprep.subr.bf16.mxu1 %v12498_v18 }
 0x418   :  { %9512 = vmatpush3.bf16.msra.mxu0 %v12534_v19  ;;  %v11545_v19 = vsub.f32 %v3382_v55, %v3414_v32  ;;  %v3444_v55 = vand.u32 4294901760, %v3392_v58  ;;  %v12442_v32 = vand.u32 4294901760, %v11344_v9 }
 0x419   :  { %9513 = vmatprep.subr.bf16.mxu0 %v12498_v18 }
 0x41a   :  { %9371 = vmatpush3.bf16.msra.mxu1 %v12535_v27  ;;  %v12433_v29 = vand.u32 4294901760, %v11545_v19 }
 0x41b   :  { %9372 = vmatprep.subr.bf16.mxu1 %v12498_v18 }
 0x41c   :  { %9515 = vmatpush3.bf16.msra.mxu0 %v12535_v27  ;;  %v11543_v27 = vsub.f32 %v3381_v14, %v3411_v62  ;;  %v3441_v14 = vand.u32 4294901760, %v3391_v60  ;;  %v12445_v62 = vand.u32 4294901760, %v11339_v10 }
 0x41d   :  { %9516 = vmatprep.subr.bf16.mxu0 %v12498_v18 }
 0x41e   :  { %9374 = vmatpush3.bf16.msra.mxu1 %v12536_v42  ;;  %v11569_v38 = vpack.c.bf16 %v3444_v55, %v3441_v14 }
 0x41f   :  { %9375 = vmatprep.subr.bf16.mxu1 %v12498_v18 }
 0x420   :  { %9518 = vmatpush3.bf16.msra.mxu0 %v12536_v42  ;;  %v11541_v42 = vsub.f32 %v3380_v47, %v3408_v25 }
 0x421   :  { %9519 = vmatprep.subr.bf16.mxu0 %v12498_v18 }
 0x422   :  { %9377 = vmatpush3.bf16.msra.mxu1 %v12537_v30  ;;  %v12436_v17 = vand.u32 4294901760, %v11541_v42 }
 0x423   :  { %9378 = vmatprep.subr.bf16.mxu1 %v12498_v18 }
 0x424   :  { %9521 = vmatpush3.bf16.msra.mxu0 %v12537_v30  ;;  %v11539_v30 = vsub.f32 %v3379_v21, %v3405_v54  ;;  %v11557_v21 = vsub.f32 %v3388_v1, %v3432_v50  ;;  %v12435_v1 = vand.u32 4294901760, %v11543_v27 }
 0x425   :  { %9522 = vmatprep.subr.bf16.mxu0 %v12498_v18 }
 0x426   :  { %9380 = vmatpush3.bf16.msra.mxu1 %v12538_v7 }
 0x427   :  { %9381 = vmatprep.subr.bf16.mxu1 %v12498_v18 }
 0x428   :  { %9524 = vmatpush3.bf16.msra.mxu0 %v12538_v7 }
 0x429   :  { %9525 = vmatprep.subr.bf16.mxu0 %v12498_v18 }
 0x42a   :  { %9383 = vmatpush3.bf16.msra.mxu1 %v12539_v43 }
 0x42b   :  { %9384 = vmatprep.subr.bf16.mxu1 %v12498_v18 }
 0x42c   :  { %9527 = vmatpush3.bf16.msra.mxu0 %v12539_v43  ;;  %v3435_v43 = vand.u32 4294901760, %v3389_v36 }
 0x42d   :  { %9528 = vmatprep.subr.bf16.mxu0 %v12498_v18 }
 0x42e   :  { %9386 = vmatpush3.bf16.msra.mxu1 %v12540_v15  ;;  %v11561_v54 = vsub.f32 %v3389_v36, %v3435_v43  ;;  %v3521_v36 = vsub.f32 %v11543_v27, %v12435_v1 }
 0x42f   :  { %9387 = vmatprep.subr.bf16.mxu1 %v12498_v18 }
 0x430   :  { %9530 = vmatpush3.bf16.msra.mxu0 %v12540_v15  ;;  %v3390_v15 = vld [vmem:[#allocation2 + $0x68] sm:$0xff] }
 0x431   :  { %7748 = vmatmul.mubr.f32.vlgmr.msra.gmra.mrb[4].mxu1 %v11262_v63  ;;  %9531 = vmatprep.subr.bf16.mxu0 %v12498_v18  ;;  %v3438_v7 = vand.u32 4294901760, %v3390_v15 }
 0x432   :  { %9389 = vmatpush3.bf16.msra.mxu1 %v10385_v37  ;;  %7782 = vmatprep.mubr.msk.f32.mxu1 %vm10288_vm0, %v12499_v57 }
 0x433   :  { %7958 = vmatmul.mubr.f32.vlgmr.msra.gmra.mrb[4].mxu0 %v11270_v3  ;;  %9390 = vmatprep.subr.bf16.mxu1 %v12498_v18  ;;  %v11559_v47 = vpack.c.bf16 %v3438_v7, %v3435_v43  ;;  %v11563_v25 = vsub.f32 %v3390_v15, %v3438_v7  ;;  %v3493_v7 = vsub.f32 %v11339_v10, %v12445_v62 }
 0x434   :  { %9533 = vmatpush3.bf16.msra.mxu0 %v10385_v37  ;;  %7992 = vmatprep.mubr.msk.f32.mxu0 %vm10288_vm0, %v12499_v57  ;;  %v3500_v43 = vsub.f32 %v11344_v9, %v12442_v32 }
 0x435   :  { %9534 = vmatprep.subr.bf16.mxu0 %v12498_v18  ;;  %v3494_v15 = vand.u32 4294901760, %v3493_v7 }
 0x436   :  { %9392 = vmatpush3.bf16.msra.mxu1 %v10394_v41  ;;  %v3501_v26 = vand.u32 4294901760, %v3500_v43  ;;  %v12434_v43 = vand.u32 4294901760, %v11547_v53 }
 0x437   :  { %9393 = vmatprep.subr.bf16.mxu1 %v12498_v18 }
 0x438   :  { %9536 = vmatpush3.bf16.msra.mxu0 %v10394_v41  ;;  %v11591_v40 = vpack.c.bf16 %v3501_v26, %v3494_v15 }
 0x439   :  { %9537 = vmatprep.subr.bf16.mxu0 %v12498_v18 }
 0x43a   :  { %9395 = vmatpush3.bf16.msra.mxu1 %v10413_v49 }
 0x43b   :  { %9396 = vmatprep.subr.bf16.mxu1 %v12498_v18 }
 0x43c   :  { %9539 = vmatpush3.bf16.msra.mxu0 %v10413_v49 }
 0x43d   :  { %9540 = vmatprep.subr.bf16.mxu0 %v12498_v18 }
 0x43e   :  { %9398 = vmatpush3.bf16.msra.mxu1 %v10453_v11 }
 0x43f   :  { %9399 = vmatprep.subr.bf16.mxu1 %v12498_v18 }
 0x440   :  { %9542 = vmatpush3.bf16.msra.mxu0 %v10453_v11 }
 0x441   :  { %9543 = vmatprep.subr.bf16.mxu0 %v12498_v18 }
 0x442   :  { %9401 = vmatpush3.bf16.msra.mxu1 %v10479_v23 }
 0x443   :  { %9402 = vmatprep.subr.bf16.mxu1 %v12498_v18 }
 0x444   :  { %9545 = vmatpush3.bf16.msra.mxu0 %v10479_v23 }
 0x445   :  { %9546 = vmatprep.subr.bf16.mxu0 %v12498_v18 }
 0x446   :  { %9404 = vmatpush3.bf16.msra.mxu1 %v10517_v24 }
 0x447   :  { %9405 = vmatprep.subr.bf16.mxu1 %v12498_v18 }
 0x448   :  { %9548 = vmatpush3.bf16.msra.mxu0 %v10517_v24 }
 0x449   :  { %9549 = vmatprep.subr.bf16.mxu0 %v12498_v18 }
 0x44a   :  { %9407 = vmatpush3.bf16.msra.mxu1 %v10534_v51 }
 0x44b   :  { %9408 = vmatprep.subr.bf16.mxu1 %v12498_v18 }
 0x44c   :  { %9551 = vmatpush3.bf16.msra.mxu0 %v10534_v51 }
 0x44d   :  { %9552 = vmatprep.subr.bf16.mxu0 %v12498_v18 }
 0x44e   :  { %9410 = vmatpush3.bf16.msra.mxu1 %v12516_v33 }
 0x44f   :  { %9555 = vmatprep.subr.bf16.mxu1 %v12498_v18 }
 0x450   :  { %9554 = vmatpush3.bf16.msra.mxu0 %v12516_v33 }
 0x451   :  { %7783 = vmatmul.mubr.f32.vlgmr.msra.gmra.mrb[4].mxu1 %v11262_v63  ;;  %9699 = vmatprep.subr.bf16.mxu0 %v12498_v18  ;;  %v3384_v63 = vld [vmem:[#allocation2 + $0x38] sm:$0xff] }
 0x452   :  { %9557 = vmatpush3.bf16.msra.mxu1 %v11490_v28  ;;  %8027 = vmatprep.mubr.msk.f32.mxu1 %vm10288_vm0, %v12499_v57  ;;  %v3420_v39 = vand.u32 4294901760, %v3384_v63 }
 0x453   :  { %7993 = vmatmul.mubr.f32.vlgmr.msra.gmra.mrb[4].mxu0 %v11270_v3  ;;  %9558 = vmatprep.subr.bf16.mxu1 %v12498_v18 }
 0x454   :  { %9701 = vmatpush3.bf16.msra.mxu0 %v10385_v37  ;;  %8237 = vmatprep.mubr.msk.f32.mxu0 %vm10288_vm0, %v12499_v57  ;;  %v11527_v3 = vpack.c.bf16 %v3420_v39, %v3417_v0  ;;  %v11549_v52 = vsub.f32 %v3384_v63, %v3420_v39  ;;  %v11571_v63 = vsub.f32 %v3391_v60, %v3441_v14  ;;  %v12439_v39 = vand.u32 4294901760, %v11539_v30 }
 0x455   :  { %9702 = vmatprep.subr.bf16.mxu0 %v12498_v18  ;;  %v11573_v0 = vsub.f32 %v3392_v58, %v3444_v55  ;;  %v3514_v60 = vsub.f32 %v11541_v42, %v12436_v17  ;;  %v3528_v14 = vsub.f32 %v11545_v19, %v12433_v29  ;;  %v3522_v55 = vand.u32 4294901760, %v3521_v36 }
 0x456   :  { %9560 = vmatpush3.bf16.msra.mxu1 %v11519_v5  ;;  %v3507_v58 = vsub.f32 %v11539_v30, %v12439_v39  ;;  %v12437_v15 = vand.u32 4294901760, %v11549_v52  ;;  %v12438_v29 = vand.u32 4294901760, %v11551_v13  ;;  %v12440_v36 = vand.u32 4294901760, %v11553_v61 }
 0x457   :  { %9561 = vmatprep.subr.bf16.mxu1 %v12498_v18  ;;  %v3515_v31 = vand.u32 4294901760, %v3514_v60  ;;  %v3529_v7 = vand.u32 4294901760, %v3528_v14  ;;  %v12441_v17 = vand.u32 4294901760, %v11555_v45  ;;  %v12444_v39 = vand.u32 4294901760, %v11561_v54 }
 0x458   :  { %9704 = vmatpush3.bf16.msra.mxu0 %v10394_v41  ;;  %v3508_v44 = vand.u32 4294901760, %v3507_v58  ;;  %v3535_v58 = vsub.f32 %v11547_v53, %v12434_v43  ;;  %v3542_v60 = vsub.f32 %v11549_v52, %v12437_v15  ;;  %v12446_v32 = vand.u32 4294901760, %v11571_v63 }
 0x459   :  { %9705 = vmatprep.subr.bf16.mxu0 %v12498_v18  ;;  %v11605_v26 = vpack.c.bf16 %v3529_v7, %v3522_v55  ;;  %v3549_v55 = vsub.f32 %v11551_v13, %v12438_v29  ;;  %v3556_v7 = vsub.f32 %v11553_v61, %v12440_v36  ;;  %v3563_v15 = vsub.f32 %v11555_v45, %v12441_v17 }
 0x45a   :  { %9563 = vmatpush3.bf16.msra.mxu1 %v11523_v16  ;;  %v11595_v50 = vpack.c.bf16 %v3515_v31, %v3508_v44  ;;  %v3536_v44 = vand.u32 4294901760, %v3535_v58  ;;  %v3543_v31 = vand.u32 4294901760, %v3542_v60  ;;  %v12443_v58 = vand.u32 4294901760, %v11557_v21 }
 0x45b   :  { %9564 = vmatprep.subr.bf16.mxu1 %v12498_v18  ;;  %v3550_v43 = vand.u32 4294901760, %v3549_v55  ;;  %v3557_v1 = vand.u32 4294901760, %v3556_v7  ;;  %v12448_v55 = vand.u32 4294901760, %v11563_v25  ;;  %v3577_v36 = vsub.f32 %v11561_v54, %v12444_v39 }
 0x45c   :  { %9707 = vmatpush3.bf16.msra.mxu0 %v10413_v49  ;;  %v9589_v14 = vpack.c.bf16 %v3543_v31, %v3536_v44  ;;  %v3570_v44 = vsub.f32 %v11557_v21, %v12443_v58  ;;  %v3564_v31 = vand.u32 4294901760, %v3563_v15  ;;  %v12447_v15 = vand.u32 4294901760, %v11573_v0 }
 0x45d   :  { %9708 = vmatprep.subr.bf16.mxu0 %v12498_v18  ;;  %v9592_v60 = vpack.c.bf16 %v3557_v1, %v3550_v43  ;;  %v3584_v1 = vsub.f32 %v11563_v25, %v12448_v55  ;;  %v3578_v43 = vand.u32 4294901760, %v3577_v36  ;;  %v3591_v58 = vsub.f32 %v11571_v63, %v12446_v32 }
 0x45e   :  { %9566 = vmatpush3.bf16.msra.mxu1 %v11527_v3  ;;  %v3571_v29 = vand.u32 4294901760, %v3570_v44  ;;  %v9604_v36 = vpack.c.bf16 %v11344_v9, %v11339_v10  ;;  %v9616_v32 = vpack.c.bf16 %v11553_v61, %v11551_v13 }
 0x45f   :  { %9567 = vmatprep.subr.bf16.mxu1 %v12498_v18  ;;  %v3585_v17 = vand.u32 4294901760, %v3584_v1  ;;  %v9607_v1 = vpack.c.bf16 %v11541_v42, %v11539_v30 }
 0x460   :  { %9710 = vmatpush3.bf16.msra.mxu0 %v10453_v11  ;;  %v9595_v7 = vpack.c.bf16 %v3571_v29, %v3564_v31  ;;  %v3598_v29 = vsub.f32 %v11573_v0, %v12447_v15  ;;  %v3592_v31 = vand.u32 4294901760, %v3591_v58  ;;  %v9619_v58 = vpack.c.bf16 %v11557_v21, %v11555_v45 }
 0x461   :  { %9711 = vmatprep.subr.bf16.mxu0 %v12498_v18  ;;  %v9598_v44 = vpack.c.bf16 %v3585_v17, %v3578_v43  ;;  %v9610_v17 = vpack.c.bf16 %v11545_v19, %v11543_v27  ;;  %v9613_v43 = vpack.c.bf16 %v11549_v52, %v11547_v53 }
 0x462   :  { %9569 = vmatpush3.bf16.msra.mxu1 %v11531_v8  ;;  %v3599_v39 = vand.u32 4294901760, %v3598_v29  ;;  %v9625_v29 = vpack.c.bf16 %v11573_v0, %v11571_v63 }
 0x463   :  { %9570 = vmatprep.subr.bf16.mxu1 %v12498_v18 }
 0x464   :  { %9713 = vmatpush3.bf16.msra.mxu0 %v10479_v23  ;;  %v9601_v62 = vpack.c.bf16 %v3599_v39, %v3592_v31  ;;  %v9622_v39 = vpack.c.bf16 %v11563_v25, %v11561_v54 }
 0x465   :  { %9714 = vmatprep.subr.bf16.mxu0 %v12498_v18 }
 0x466   :  { %9572 = vmatpush3.bf16.msra.mxu1 %v11535_v46 }
 0x467   :  { %9573 = vmatprep.subr.bf16.mxu1 %v12498_v18 }
 0x468   :  { %9716 = vmatpush3.bf16.msra.mxu0 %v10517_v24 }
 0x469   :  { %9717 = vmatprep.subr.bf16.mxu0 %v12498_v18 }
 0x46a   :  { %9575 = vmatpush3.bf16.msra.mxu1 %v11559_v47 }
 0x46b   :  { %9576 = vmatprep.subr.bf16.mxu1 %v12498_v18 }
 0x46c   :  { %9719 = vmatpush3.bf16.msra.mxu0 %v10534_v51 }
 0x46d   :  { %9720 = vmatprep.subr.bf16.mxu0 %v12498_v18 }
 0x46e   :  { %9578 = vmatpush3.bf16.msra.mxu1 %v11569_v38 }
 0x46f   :  { %9579 = vmatprep.subr.bf16.mxu1 %v12498_v18 }
 0x470   :  { %9722 = vmatpush3.bf16.msra.mxu0 %v12516_v33 }
 0x471   :  { %9723 = vmatprep.subr.bf16.mxu0 %v12498_v18 }
 0x524   :  { %v2725_v31 = vpop.f32.mrb[4].mxu1 }
 0x525   :  { %v3371_v15 = vmul.f32 %v2725_v31, %v2725_v31  ;;  %v7784_v55 = vpop.f32.mrb[5].mxu1  ;;  %v3373_v20 = vsub.f32 %v11259_v59, %v2725_v31  ;;  %v12568_v31 = vld [vmem:[#allocation27_spill] sm:$0xff] }
 0x526   :  { %v3367_v22 = vpop.f32.mrb[4].mxu0  ;;  %v12561_v55 = vld [vmem:[#allocation15_spill] sm:$0xff] }
 0x527   :  { %v3372_v35 = vsub.f32 %v3367_v22, %v3371_v15  ;;  %v7994_v6 = vpop.f32.mrb[5].mxu0  ;;  %v12563_v15 = vld [vmem:[#allocation18_spill] sm:$0xff] }
 0x529   :  { %v3374_v4 = vadd.f32 1e-05, %v3372_v35  ;;  %v12548_v35 = vand.u32 4294901760, %v11549_v52  ;;  %v12553_v52 = vand.u32 4294901760, %v11561_v54 }
 0x52b   :  { %10232 = vrsqrt.f32 %v3374_v4  ;;  %v12546_v4 = vand.u32 4294901760, %v11545_v19  ;;  %v12551_v19 = vand.u32 4294901760, %v11555_v45  ;;  %v12558_v45 = vld [vmem:[#allocation9_spill] sm:$0xff] }
 0x535   :  { %v10233_v48 = vpop.eup %10232 }
 0x536   :  { %v3376_v2 = vmul.f32 %v10233_v48, %v3373_v20  ;;  %v12545_v20 = vand.u32 4294901760, %v11543_v27  ;;  %v12552_v27 = vand.u32 4294901760, %v11557_v21 }
 0x538   :  { %v11662_v56 = vand.u32 4294901760, %v3376_v2  ;;  %v9658_v6 = vpack.c.bf16 %v12546_v4, %v12545_v20  ;;  %v12573_v20 = vld [vmem:[#allocation32_spill] sm:$0xff]  ;;  %v12574_v4 = vld [vmem:[#allocation33_spill] sm:$0xff] }
 0x53a   :  { %v3480_v34 = vsub.f32 %v3376_v2, %v11662_v56  ;;  %v12544_v2 = vand.u32 4294901760, %v11541_v42 }
 0x53c   :  { %v3481_v12 = vand.u32 4294901760, %v3480_v34 }
 0x53e   :  { %v3482_v33 = vsub.f32 %v3480_v34, %v3481_v12 }
 0x540   :  { %v3483_v51 = vand.u32 4294901760, %v3482_v33  ;;  %v12542_v33 = vand.u32 4294901760, %v11344_v9  ;;  %v12550_v9 = vand.u32 4294901760, %v11553_v61  ;;  %v12555_v61 = vand.u32 4294901760, %v11571_v63 }
 0x542   :  { %8028 = vmatmul.mubr.f32.vlgmr.msra.gmra.mrb[6].mxu1 %v3483_v51  ;;  %v12541_v51 = vand.u32 4294901760, %v11339_v10  ;;  %v12549_v10 = vand.u32 4294901760, %v11551_v13  ;;  %v12556_v13 = vand.u32 4294901760, %v11573_v0 }
 0x543   :  { %9581 = vmatpush3.bf16.msra.mxu1 %v11591_v40  ;;  %8062 = vmatprep.mubr.msk.f32.mxu1 %vm10288_vm0, %v12499_v57 }
 0x544   :  { %9582 = vmatprep.subr.bf16.mxu1 %v12498_v18  ;;  %v9652_v59 = vpack.c.bf16 %v12542_v33, %v12541_v51  ;;  %v9664_v42 = vpack.c.bf16 %v12550_v9, %v12549_v10  ;;  %v12579_v10 = vld [vmem:[#allocation19_spill] sm:$0xff]  ;;  %v12580_v9 = vld [vmem:[#allocation20_spill] sm:$0xff] }
 0x547   :  { %9584 = vmatpush3.bf16.msra.mxu1 %v11595_v50 }
 0x548   :  { %9585 = vmatprep.subr.bf16.mxu1 %v12498_v18 }
 0x54b   :  { %9587 = vmatpush3.bf16.msra.mxu1 %v11605_v26 }
 0x54c   :  { %9588 = vmatprep.subr.bf16.mxu1 %v12498_v18 }
 0x54f   :  { %9590 = vmatpush3.bf16.msra.mxu1 %v9589_v14  ;;  %v12559_v14 = vld [vmem:[#allocation11_spill] sm:$0xff] }
 0x550   :  { %9591 = vmatprep.subr.bf16.mxu1 %v12498_v18 }
 0x553   :  { %9593 = vmatpush3.bf16.msra.mxu1 %v9592_v60  ;;  %v12560_v60 = vld [vmem:[#allocation13_spill] sm:$0xff] }
 0x554   :  { %9594 = vmatprep.subr.bf16.mxu1 %v12498_v18 }
 0x557   :  { %9596 = vmatpush3.bf16.msra.mxu1 %v9595_v7  ;;  %v12562_v7 = vld [vmem:[#allocation17_spill] sm:$0xff] }
 0x558   :  { %9597 = vmatprep.subr.bf16.mxu1 %v12498_v18 }
 0x55b   :  { %9599 = vmatpush3.bf16.msra.mxu1 %v9598_v44  ;;  %v12564_v44 = vld [vmem:[#allocation21_spill] sm:$0xff] }
 0x55c   :  { %9600 = vmatprep.subr.bf16.mxu1 %v12498_v18 }
 0x55f   :  { %9602 = vmatpush3.bf16.msra.mxu1 %v9601_v62 }
 0x560   :  { %9603 = vmatprep.subr.bf16.mxu1 %v12498_v18 }
 0x562   :  { %8063 = vmatmul.mubr.f32.vlgmr.msra.gmra.mrb[6].mxu1 %v11662_v56 }
 0x563   :  { %9605 = vmatpush3.bf16.msra.mxu1 %v9604_v36  ;;  %8097 = vmatprep.mubr.msk.f32.mxu1 %vm10288_vm0, %v12499_v57  ;;  %v12565_v36 = vld [vmem:[#allocation22_spill] sm:$0xff] }
 0x564   :  { %9606 = vmatprep.subr.bf16.mxu1 %v12498_v18 }
 0x567   :  { %9608 = vmatpush3.bf16.msra.mxu1 %v9607_v1  ;;  %v12566_v1 = vld [vmem:[#allocation24_spill] sm:$0xff] }
 0x568   :  { %9609 = vmatprep.subr.bf16.mxu1 %v12498_v18 }
 0x56b   :  { %9611 = vmatpush3.bf16.msra.mxu1 %v9610_v17  ;;  %v12567_v17 = vld [vmem:[#allocation26_spill] sm:$0xff] }
 0x56c   :  { %9612 = vmatprep.subr.bf16.mxu1 %v12498_v18 }
 0x56f   :  { %9614 = vmatpush3.bf16.msra.mxu1 %v9613_v43  ;;  %v11859_v43 = vld [vmem:[%s12346_s3] sm:$0xff] }
 0x570   :  { %9615 = vmatprep.subr.bf16.mxu1 %v12498_v18 }
 0x573   :  { %9617 = vmatpush3.bf16.msra.mxu1 %v9616_v32  ;;  %v9673_v32 = vpack.c.bf16 %v12556_v13, %v12555_v61  ;;  %v5335_v61 = vld [vmem:[%s12346_s3 + $0x30] sm:$0xff]  ;;  %v5336_v13 = vld [vmem:[%s12346_s3 + $0x38] sm:$0xff] }
 0x574   :  { %9618 = vmatprep.subr.bf16.mxu1 %v12498_v18 }
 0x577   :  { %9620 = vmatpush3.bf16.msra.mxu1 %v9619_v58  ;;  %v11864_v58 = vld [vmem:[%s12346_s3 + $0x8] sm:$0xff] }
 0x578   :  { %9621 = vmatprep.subr.bf16.mxu1 %v12498_v18 }
 0x57b   :  { %9623 = vmatpush3.bf16.msra.mxu1 %v9622_v39  ;;  %v5351_v39 = vand.u32 4294901760, %v11859_v43 }
 0x57c   :  { %9624 = vmatprep.subr.bf16.mxu1 %v12498_v18 }
 0x57d   :  { %v11876_v51 = vsub.f32 %v11859_v43, %v5351_v39 }
 0x57f   :  { %9626 = vmatpush3.bf16.msra.mxu1 %v9625_v29  ;;  %v5354_v29 = vand.u32 4294901760, %v11864_v58 }
 0x580   :  { %9627 = vmatprep.subr.bf16.mxu1 %v12498_v18 }
 0x581   :  { %v11881_v33 = vsub.f32 %v11864_v58, %v5354_v29 }
 0x582   :  { %8098 = vmatmul.mubr.f32.vlgmr.msra.gmra.mrb[6].mxu1 %v3480_v34  ;;  %v12543_v34 = vand.u32 4294901760, %v11539_v30  ;;  %v9667_v30 = vpack.c.bf16 %v12552_v27, %v12551_v19  ;;  %v12582_v19 = vld [vmem:[#allocation25_spill] sm:$0xff]  ;;  %v5333_v27 = vld [vmem:[%s12346_s3 + $0x20] sm:$0xff] }
 0x583   :  { %9629 = vmatpush3.bf16.msra.mxu1 %v11490_v28  ;;  %8132 = vmatprep.mubr.msk.f32.mxu1 %vm10288_vm0, %v12499_v57 }
 0x584   :  { %9630 = vmatprep.subr.bf16.mxu1 %v12498_v18  ;;  %v9655_v48 = vpack.c.bf16 %v12544_v2, %v12543_v34  ;;  %v12570_v34 = vld [vmem:[#allocation29_spill] sm:$0xff]  ;;  %v12571_v2 = vld [vmem:[#allocation30_spill] sm:$0xff] }
 0x587   :  { %9632 = vmatpush3.bf16.msra.mxu1 %v11519_v5 }
 0x588   :  { %9633 = vmatprep.subr.bf16.mxu1 %v12498_v18 }
 0x58b   :  { %9635 = vmatpush3.bf16.msra.mxu1 %v11523_v16 }
 0x58c   :  { %9636 = vmatprep.subr.bf16.mxu1 %v12498_v18 }
 0x58f   :  { %9638 = vmatpush3.bf16.msra.mxu1 %v11527_v3 }
 0x590   :  { %9639 = vmatprep.subr.bf16.mxu1 %v12498_v18 }
 0x593   :  { %9641 = vmatpush3.bf16.msra.mxu1 %v11531_v8 }
 0x594   :  { %9642 = vmatprep.subr.bf16.mxu1 %v12498_v18 }
 0x597   :  { %9644 = vmatpush3.bf16.msra.mxu1 %v11535_v46 }
 0x598   :  { %9645 = vmatprep.subr.bf16.mxu1 %v12498_v18 }
 0x59b   :  { %9647 = vmatpush3.bf16.msra.mxu1 %v11559_v47 }
 0x59c   :  { %9648 = vmatprep.subr.bf16.mxu1 %v12498_v18 }
 0x59f   :  { %9650 = vmatpush3.bf16.msra.mxu1 %v11569_v38 }
 0x5a0   :  { %9651 = vmatprep.subr.bf16.mxu1 %v12498_v18 }
 0x5a2   :  { %8133 = vmatmul.mubr.f32.vlgmr.msra.gmra.mrb[6].mxu1 %v3481_v12  ;;  %v12547_v12 = vand.u32 4294901760, %v11547_v53  ;;  %v12554_v53 = vand.u32 4294901760, %v11563_v25 }
 0x5a3   :  { %9653 = vmatpush3.bf16.msra.mxu1 %v9652_v59  ;;  %8167 = vmatprep.mubr.msk.f32.mxu1 %vm10288_vm0, %v12499_v57  ;;  %v12569_v59 = vld [vmem:[#allocation28_spill] sm:$0xff] }
 0x5a4   :  { %9654 = vmatprep.subr.bf16.mxu1 %v12498_v18  ;;  %v9661_v22 = vpack.c.bf16 %v12548_v35, %v12547_v12  ;;  %v9670_v62 = vpack.c.bf16 %v12554_v53, %v12553_v52  ;;  %v12576_v12 = vld [vmem:[#allocation12_spill] sm:$0xff]  ;;  %v12577_v35 = vld [vmem:[#allocation14_spill] sm:$0xff]  ;;  %v5363_v52 = vand.u32 4294901760, %v5333_v27 }
 0x5a7   :  { %9656 = vmatpush3.bf16.msra.mxu1 %v9655_v48  ;;  %v12572_v48 = vld [vmem:[#allocation31_spill] sm:$0xff] }
 0x5a8   :  { %9657 = vmatprep.subr.bf16.mxu1 %v12498_v18 }
 0x5ab   :  { %9659 = vmatpush3.bf16.msra.mxu1 %v9658_v6  ;;  %v12575_v6 = vld [vmem:[#allocation10_spill] sm:$0xff] }
 0x5ac   :  { %9660 = vmatprep.subr.bf16.mxu1 %v12498_v18 }
 0x5af   :  { %9662 = vmatpush3.bf16.msra.mxu1 %v9661_v22  ;;  %v12578_v22 = vld [vmem:[#allocation16_spill] sm:$0xff] }
 0x5b0   :  { %9663 = vmatprep.subr.bf16.mxu1 %v12498_v18 }
 0x5b3   :  { %9665 = vmatpush3.bf16.msra.mxu1 %v9664_v42  ;;  %v12581_v42 = vld [vmem:[#allocation23_spill] sm:$0xff] }
 0x5b4   :  { %9666 = vmatprep.subr.bf16.mxu1 %v12498_v18 }
 0x5b7   :  { %9668 = vmatpush3.bf16.msra.mxu1 %v9667_v30  ;;  %v5334_v30 = vld [vmem:[%s12346_s3 + $0x28] sm:$0xff] }
 0x5b8   :  { %9669 = vmatprep.subr.bf16.mxu1 %v12498_v18  ;;  %v5366_v53 = vand.u32 4294901760, %v5334_v30 }
 0x5bb   :  { %9671 = vmatpush3.bf16.msra.mxu1 %v9670_v62  ;;  %v12053_v62 = vpack.c.bf16 %v5366_v53, %v5363_v52 }
 0x5bc   :  { %9672 = vmatprep.subr.bf16.mxu1 %v12498_v18 }
 0x5bf   :  { %9674 = vmatpush3.bf16.msra.mxu1 %v9673_v32  ;;  %v5369_v32 = vand.u32 4294901760, %v5335_v61 }
 0x5c0   :  { %9675 = vmatprep.subr.bf16.mxu1 %v12498_v18 }
 0x5c2   :  { %8168 = vmatmul.mubr.f32.vlgmr.msra.gmra.mrb[6].mxu1 %v11662_v56 }
 0x5c3   :  { %9677 = vmatpush3.bf16.msra.mxu1 %v11490_v28  ;;  %8202 = vmatprep.mubr.msk.f32.mxu1 %vm10288_vm0, %v12499_v57  ;;  %v6025_v28 = vld [vmem:[%s12347_s4 + $0x1] ss:$0 sm:$0xff] }
 0x5c4   :  { %9678 = vmatprep.subr.bf16.mxu1 %v12498_v18 }
 0x5c7   :  { %9680 = vmatpush3.bf16.msra.mxu1 %v11519_v5 }
 0x5c8   :  { %9681 = vmatprep.subr.bf16.mxu1 %v12498_v18 }
 0x5cb   :  { %9683 = vmatpush3.bf16.msra.mxu1 %v11523_v16 }
 0x5cc   :  { %9684 = vmatprep.subr.bf16.mxu1 %v12498_v18 }
 0x5cf   :  { %9686 = vmatpush3.bf16.msra.mxu1 %v11527_v3 }
 0x5d0   :  { %9687 = vmatprep.subr.bf16.mxu1 %v12498_v18 }
 0x5d3   :  { %9689 = vmatpush3.bf16.msra.mxu1 %v11531_v8 }
 0x5d4   :  { %9690 = vmatprep.subr.bf16.mxu1 %v12498_v18 }
 0x5d7   :  { %9692 = vmatpush3.bf16.msra.mxu1 %v11535_v46 }
 0x5d8   :  { %9693 = vmatprep.subr.bf16.mxu1 %v12498_v18 }
 0x5db   :  { %9695 = vmatpush3.bf16.msra.mxu1 %v11559_v47 }
 0x5dc   :  { %9696 = vmatprep.subr.bf16.mxu1 %v12498_v18 }
 0x5df   :  { %9698 = vmatpush3.bf16.msra.mxu1 %v11569_v38 }
 0x5e0   :  { %9843 = vmatprep.subr.bf16.mxu1 %v12498_v18 }
 0x5e2   :  { %8203 = vmatmul.mubr.f32.vlgmr.msra.gmra.mrb[6].mxu1 %v11662_v56  ;;  %v12557_v56 = vld [vmem:[#allocation8_spill] sm:$0xff] }
 0x5e3   :  { %9845 = vmatpush3.bf16.msra.mxu1 %v10385_v37  ;;  %8447 = vmatprep.mubr.msk.f32.mxu1 %vm10288_vm0, %v12499_v57 }
 0x5e4   :  { %9846 = vmatprep.subr.bf16.mxu1 %v12498_v18 }
 0x5e7   :  { %9848 = vmatpush3.bf16.msra.mxu1 %v10394_v41 }
 0x5e8   :  { %9849 = vmatprep.subr.bf16.mxu1 %v12498_v18 }
 0x5eb   :  { %9851 = vmatpush3.bf16.msra.mxu1 %v10413_v49 }
 0x5ec   :  { %9852 = vmatprep.subr.bf16.mxu1 %v12498_v18 }
 0x5ef   :  { %9854 = vmatpush3.bf16.msra.mxu1 %v10453_v11 }
 0x5f0   :  { %9855 = vmatprep.subr.bf16.mxu1 %v12498_v18 }
 0x5f3   :  { %9857 = vmatpush3.bf16.msra.mxu1 %v10479_v23 }
 0x5f4   :  { %9858 = vmatprep.subr.bf16.mxu1 %v12498_v18 }
 0x5f7   :  { %9860 = vmatpush3.bf16.msra.mxu1 %v10517_v24 }
 0x5f8   :  { %9861 = vmatprep.subr.bf16.mxu1 %v12498_v18 }
 0x5fb   :  { %9863 = vmatpush3.bf16.msra.mxu1 %v12557_v56 }
 0x5fc   :  { %9864 = vmatprep.subr.bf16.mxu1 %v12498_v18 }
 0x5ff   :  { %9866 = vmatpush3.bf16.msra.mxu1 %v12558_v45 }
 0x600   :  { %9867 = vmatprep.subr.bf16.mxu1 %v12498_v18 }
 0x6b5   :  { %v4035_v5 = vpop.f32.mrb[6].mxu1 }
 0x6b6   :  { %v10133_v16 = vadd.f32 %v6025_v28, %v4035_v5  ;;  %v8204_v3 = vpop.f32.mrb[7].mxu1  ;;  %v5337_v28 = vld [vmem:[%s12346_s3 + $0x40] sm:$0xff]  ;;  %v5338_v5 = vld [vmem:[%s12346_s3 + $0x48] sm:$0xff] }
 0x6b7   :  { %v5378_v3 = vand.u32 4294901760, %v5338_v5 }
 0x6b8   :  { %v11790_v8 = vmax.f32 %v10133_v16, 0.0  ;;  %v5375_v16 = vand.u32 4294901760, %v5337_v28 }
 0x6ba   :  { %v11793_v46 = vand.u32 4294901760, %v11790_v8  ;;  %v4681_v21 = vmul.f32 %v11790_v8, %v11790_v8 }
 0x6bc   :  { %v11799_v47 = vsub.f32 %v11790_v8, %v11793_v46  ;;  %v11801_v54 = vand.u32 4294901760, %v4681_v21 }
 0x6be   :  { %v11804_v25 = vsub.f32 %v4681_v21, %v11801_v54  ;;  %v4123_v38 = vand.u32 4294901760, %v11799_v47  ;;  %v5339_v21 = vld [vmem:[%s12346_s3 + $0x50] sm:$0xff] }
 0x6c0   :  { %v4124_v63 = vsub.f32 %v11799_v47, %v4123_v38  ;;  %v4765_v0 = vand.u32 4294901760, %v11804_v25 }
 0x6c2   :  { %v4125_v40 = vand.u32 4294901760, %v4124_v63  ;;  %v4766_v50 = vsub.f32 %v11804_v25, %v4765_v0  ;;  %v5341_v63 = vld [vmem:[%s12346_s3 + $0x60] sm:$0xff] }
 0x6c4   :  { %8238 = vmatmul.mubr.f32.vlgmr.msra.gmra.mrb[6].mxu0 %v4125_v40  ;;  %v4767_v26 = vand.u32 4294901760, %v4766_v50  ;;  %v5387_v40 = vand.u32 4294901760, %v5341_v63 }
 0x6c5   :  { %9725 = vmatpush3.bf16.msra.mxu0 %v12559_v14  ;;  %8272 = vmatprep.mubr.msk.f32.mxu0 %vm10288_vm0, %v12499_v57 }
 0x6c6   :  { %8448 = vmatmul.mubr.f32.vlgmr.msra.gmra.mrb[8].mxu1 %v4767_v26  ;;  %9726 = vmatprep.subr.bf16.mxu0 %v12498_v18 }
 0x6c7   :  { %9869 = vmatpush3.bf16.msra.mxu1 %v12559_v14  ;;  %8482 = vmatprep.mubr.msk.f32.mxu1 %vm10288_vm0, %v12499_v57 }
 0x6c8   :  { %9870 = vmatprep.subr.bf16.mxu1 %v12498_v18 }
 0x6c9   :  { %9728 = vmatpush3.bf16.msra.mxu0 %v12560_v60 }
 0x6ca   :  { %9729 = vmatprep.subr.bf16.mxu0 %v12498_v18 }
 0x6cb   :  { %9872 = vmatpush3.bf16.msra.mxu1 %v12560_v60  ;;  %v12097_v60 = vsub.f32 %v5333_v27, %v5363_v52 }
 0x6cc   :  { %9873 = vmatprep.subr.bf16.mxu1 %v12498_v18 }
 0x6cd   :  { %9731 = vmatpush3.bf16.msra.mxu0 %v12561_v55  ;;  %v5472_v27 = vand.u32 4294901760, %v12097_v60 }
 0x6ce   :  { %9732 = vmatprep.subr.bf16.mxu0 %v12498_v18 }
 0x6cf   :  { %9875 = vmatpush3.bf16.msra.mxu1 %v12561_v55  ;;  %v12099_v55 = vsub.f32 %v5334_v30, %v5366_v53  ;;  %v5473_v53 = vsub.f32 %v12097_v60, %v5472_v27 }
 0x6d0   :  { %9876 = vmatprep.subr.bf16.mxu1 %v12498_v18 }
 0x6d1   :  { %9734 = vmatpush3.bf16.msra.mxu0 %v12562_v7  ;;  %v5479_v30 = vand.u32 4294901760, %v12099_v55 }
 0x6d2   :  { %9735 = vmatprep.subr.bf16.mxu0 %v12498_v18 }
 0x6d3   :  { %9878 = vmatpush3.bf16.msra.mxu1 %v12562_v7  ;;  %v5343_v7 = vld [vmem:[%s12346_s3 + $0x70] sm:$0xff] }
 0x6d4   :  { %9879 = vmatprep.subr.bf16.mxu1 %v12498_v18 }
 0x6d5   :  { %9737 = vmatpush3.bf16.msra.mxu0 %v12563_v15 }
 0x6d6   :  { %9738 = vmatprep.subr.bf16.mxu0 %v12498_v18 }
 0x6d7   :  { %9881 = vmatpush3.bf16.msra.mxu1 %v12563_v15  ;;  %v5344_v15 = vld [vmem:[%s12346_s3 + $0x78] sm:$0xff] }
 0x6d8   :  { %9882 = vmatprep.subr.bf16.mxu1 %v12498_v18 }
 0x6d9   :  { %9740 = vmatpush3.bf16.msra.mxu0 %v12564_v44 }
 0x6da   :  { %9741 = vmatprep.subr.bf16.mxu0 %v12498_v18 }
 0x6db   :  { %9884 = vmatpush3.bf16.msra.mxu1 %v12564_v44  ;;  %v12107_v44 = vsub.f32 %v5335_v61, %v5369_v32  ;;  %v5480_v61 = vsub.f32 %v12099_v55, %v5479_v30 }
 0x6dc   :  { %9885 = vmatprep.subr.bf16.mxu1 %v12498_v18 }
 0x6dd   :  { %9743 = vmatpush3.bf16.msra.mxu0 %v12565_v36 }
 0x6de   :  { %9744 = vmatprep.subr.bf16.mxu0 %v12498_v18 }
 0x6df   :  { %9887 = vmatpush3.bf16.msra.mxu1 %v12565_v36 }
 0x6e0   :  { %9888 = vmatprep.subr.bf16.mxu1 %v12498_v18 }
 0x6e1   :  { %9746 = vmatpush3.bf16.msra.mxu0 %v12566_v1 }
 0x6e2   :  { %9747 = vmatprep.subr.bf16.mxu0 %v12498_v18 }
 0x6e3   :  { %9890 = vmatpush3.bf16.msra.mxu1 %v12566_v1  ;;  %v12111_v1 = vsub.f32 %v5337_v28, %v5375_v16 }
 0x6e4   :  { %8273 = vmatmul.mubr.f32.vlgmr.msra.gmra.mrb[6].mxu0 %v11793_v46  ;;  %9891 = vmatprep.subr.bf16.mxu1 %v12498_v18 }
 0x6e5   :  { %9749 = vmatpush3.bf16.msra.mxu0 %v12567_v17  ;;  %8307 = vmatprep.mubr.msk.f32.mxu0 %vm10288_vm0, %v12499_v57 }
 0x6e6   :  { %8483 = vmatmul.mubr.f32.vlgmr.msra.gmra.mrb[8].mxu1 %v11801_v54  ;;  %9750 = vmatprep.subr.bf16.mxu0 %v12498_v18 }
 0x6e7   :  { %9893 = vmatpush3.bf16.msra.mxu1 %v12567_v17  ;;  %8517 = vmatprep.mubr.msk.f32.mxu1 %vm10288_vm0, %v12499_v57  ;;  %v12113_v17 = vsub.f32 %v5338_v5, %v5378_v3 }
 0x6e8   :  { %9894 = vmatprep.subr.bf16.mxu1 %v12498_v18 }
 0x6e9   :  { %9752 = vmatpush3.bf16.msra.mxu0 %v12568_v31 }
 0x6ea   :  { %9753 = vmatprep.subr.bf16.mxu0 %v12498_v18 }
 0x6eb   :  { %9896 = vmatpush3.bf16.msra.mxu1 %v12568_v31 }
 0x6ec   :  { %9897 = vmatprep.subr.bf16.mxu1 %v12498_v18 }
 0x6ed   :  { %9755 = vmatpush3.bf16.msra.mxu0 %v12569_v59 }
 0x6ee   :  { %9756 = vmatprep.subr.bf16.mxu0 %v12498_v18 }
 0x6ef   :  { %9899 = vmatpush3.bf16.msra.mxu1 %v12569_v59  ;;  %v5393_v59 = vand.u32 4294901760, %v5343_v7 }
 0x6f0   :  { %9900 = vmatprep.subr.bf16.mxu1 %v12498_v18 }
 0x6f1   :  { %9758 = vmatpush3.bf16.msra.mxu0 %v12570_v34 }
 0x6f2   :  { %9759 = vmatprep.subr.bf16.mxu0 %v12498_v18 }
 0x6f3   :  { %9902 = vmatpush3.bf16.msra.mxu1 %v12570_v34  ;;  %v5396_v34 = vand.u32 4294901760, %v5344_v15 }
 0x6f4   :  { %9903 = vmatprep.subr.bf16.mxu1 %v12498_v18 }
 0x6f5   :  { %9761 = vmatpush3.bf16.msra.mxu0 %v12571_v2 }
 0x6f6   :  { %9762 = vmatprep.subr.bf16.mxu0 %v12498_v18 }
 0x6f7   :  { %9905 = vmatpush3.bf16.msra.mxu1 %v12571_v2  ;;  %v5444_v2 = vand.u32 4294901760, %v11876_v51 }
 0x6f8   :  { %9906 = vmatprep.subr.bf16.mxu1 %v12498_v18 }
 0x6f9   :  { %9764 = vmatpush3.bf16.msra.mxu0 %v12572_v48 }
 0x6fa   :  { %9765 = vmatprep.subr.bf16.mxu0 %v12498_v18 }
 0x6fb   :  { %9908 = vmatpush3.bf16.msra.mxu1 %v12572_v48  ;;  %v5451_v48 = vand.u32 4294901760, %v11881_v33 }
 0x6fc   :  { %9909 = vmatprep.subr.bf16.mxu1 %v12498_v18 }
 0x6fd   :  { %9767 = vmatpush3.bf16.msra.mxu0 %v12573_v20 }
 0x6fe   :  { %9768 = vmatprep.subr.bf16.mxu0 %v12498_v18 }
 0x6ff   :  { %9911 = vmatpush3.bf16.msra.mxu1 %v12573_v20  ;;  %v12129_v20 = vpack.c.bf16 %v5396_v34, %v5393_v59 }
 0x700   :  { %9912 = vmatprep.subr.bf16.mxu1 %v12498_v18 }
 0x701   :  { %9770 = vmatpush3.bf16.msra.mxu0 %v12574_v4 }
 0x702   :  { %9771 = vmatprep.subr.bf16.mxu0 %v12498_v18 }
 0x703   :  { %9914 = vmatpush3.bf16.msra.mxu1 %v12574_v4  ;;  %v12131_v4 = vsub.f32 %v5343_v7, %v5393_v59 }
 0x704   :  { %8308 = vmatmul.mubr.f32.vlgmr.msra.gmra.mrb[6].mxu0 %v11799_v47  ;;  %9915 = vmatprep.subr.bf16.mxu1 %v12498_v18  ;;  %v5340_v47 = vld [vmem:[%s12346_s3 + $0x58] sm:$0xff] }
 0x705   :  { %9773 = vmatpush3.bf16.msra.mxu0 %v10385_v37  ;;  %8342 = vmatprep.mubr.msk.f32.mxu0 %vm10288_vm0, %v12499_v57 }
 0x706   :  { %8518 = vmatmul.mubr.f32.vlgmr.msra.gmra.mrb[8].mxu1 %v11804_v25  ;;  %9774 = vmatprep.subr.bf16.mxu0 %v12498_v18  ;;  %v5384_v25 = vand.u32 4294901760, %v5340_v47 }
 0x707   :  { %9917 = vmatpush3.bf16.msra.mxu1 %v10385_v37  ;;  %8552 = vmatprep.mubr.msk.f32.mxu1 %vm10288_vm0, %v12499_v57 }
 0x708   :  { %9918 = vmatprep.subr.bf16.mxu1 %v12498_v18  ;;  %v12117_v58 = vsub.f32 %v5340_v47, %v5384_v25 }
 0x709   :  { %9776 = vmatpush3.bf16.msra.mxu0 %v10394_v41 }
 0x70a   :  { %9777 = vmatprep.subr.bf16.mxu0 %v12498_v18  ;;  %v12466_v59 = vand.u32 4294901760, %v12117_v58 }
 0x70b   :  { %9920 = vmatpush3.bf16.msra.mxu1 %v10394_v41 }
 0x70c   :  { %9921 = vmatprep.subr.bf16.mxu1 %v12498_v18 }
 0x70d   :  { %9779 = vmatpush3.bf16.msra.mxu0 %v10413_v49 }
 0x70e   :  { %9780 = vmatprep.subr.bf16.mxu0 %v12498_v18 }
 0x70f   :  { %9923 = vmatpush3.bf16.msra.mxu1 %v10413_v49 }
 0x710   :  { %9924 = vmatprep.subr.bf16.mxu1 %v12498_v18 }
 0x711   :  { %9782 = vmatpush3.bf16.msra.mxu0 %v10453_v11 }
 0x712   :  { %9783 = vmatprep.subr.bf16.mxu0 %v12498_v18 }
 0x713   :  { %9926 = vmatpush3.bf16.msra.mxu1 %v10453_v11 }
 0x714   :  { %9927 = vmatprep.subr.bf16.mxu1 %v12498_v18 }
 0x715   :  { %9785 = vmatpush3.bf16.msra.mxu0 %v10479_v23 }
 0x716   :  { %9786 = vmatprep.subr.bf16.mxu0 %v12498_v18 }
 0x717   :  { %9929 = vmatpush3.bf16.msra.mxu1 %v10479_v23 }
 0x718   :  { %9930 = vmatprep.subr.bf16.mxu1 %v12498_v18 }
 0x719   :  { %9788 = vmatpush3.bf16.msra.mxu0 %v10517_v24 }
 0x71a   :  { %9789 = vmatprep.subr.bf16.mxu0 %v12498_v18 }
 0x71b   :  { %9932 = vmatpush3.bf16.msra.mxu1 %v10517_v24 }
 0x71c   :  { %9933 = vmatprep.subr.bf16.mxu1 %v12498_v18 }
 0x71d   :  { %9791 = vmatpush3.bf16.msra.mxu0 %v12557_v56 }
 0x71e   :  { %9792 = vmatprep.subr.bf16.mxu0 %v12498_v18 }
 0x71f   :  { %9935 = vmatpush3.bf16.msra.mxu1 %v12557_v56 }
 0x720   :  { %9936 = vmatprep.subr.bf16.mxu1 %v12498_v18 }
 0x721   :  { %9794 = vmatpush3.bf16.msra.mxu0 %v12558_v45 }
 0x722   :  { %9795 = vmatprep.subr.bf16.mxu0 %v12498_v18 }
 0x723   :  { %9938 = vmatpush3.bf16.msra.mxu1 %v12558_v45 }
 0x724   :  { %8343 = vmatmul.mubr.f32.vlgmr.msra.gmra.mrb[6].mxu0 %v4123_v38  ;;  %9939 = vmatprep.subr.bf16.mxu1 %v12498_v18 }
 0x725   :  { %9797 = vmatpush3.bf16.msra.mxu0 %v12575_v6  ;;  %8377 = vmatprep.mubr.msk.f32.mxu0 %vm10288_vm0, %v12499_v57 }
 0x726   :  { %8553 = vmatmul.mubr.f32.vlgmr.msra.gmra.mrb[8].mxu1 %v4765_v0  ;;  %9798 = vmatprep.subr.bf16.mxu0 %v12498_v18  ;;  %v5342_v0 = vld [vmem:[%s12346_s3 + $0x68] sm:$0xff] }
 0x727   :  { %9941 = vmatpush3.bf16.msra.mxu1 %v12575_v6  ;;  %8587 = vmatprep.mubr.msk.f32.mxu1 %vm10288_vm0, %v12499_v57  ;;  %v5390_v50 = vand.u32 4294901760, %v5342_v0  ;;  %v12133_v6 = vsub.f32 %v5344_v15, %v5396_v34 }
 0x728   :  { %9942 = vmatprep.subr.bf16.mxu1 %v12498_v18 }
 0x729   :  { %9800 = vmatpush3.bf16.msra.mxu0 %v12576_v12  ;;  %v12123_v31 = vsub.f32 %v5342_v0, %v5390_v50 }
 0x72a   :  { %9801 = vmatprep.subr.bf16.mxu0 %v12498_v18 }
 0x72b   :  { %9944 = vmatpush3.bf16.msra.mxu1 %v12576_v12  ;;  %v5445_v12 = vsub.f32 %v11876_v51, %v5444_v2 }
 0x72c   :  { %9945 = vmatprep.subr.bf16.mxu1 %v12498_v18 }
 0x72d   :  { %9803 = vmatpush3.bf16.msra.mxu0 %v12577_v35 }
 0x72e   :  { %9804 = vmatprep.subr.bf16.mxu0 %v12498_v18 }
 0x72f   :  { %9947 = vmatpush3.bf16.msra.mxu1 %v12577_v35  ;;  %v5452_v35 = vsub.f32 %v11881_v33, %v5451_v48 }
 0x730   :  { %9948 = vmatprep.subr.bf16.mxu1 %v12498_v18 }
 0x731   :  { %9806 = vmatpush3.bf16.msra.mxu0 %v12578_v22 }
 0x732   :  { %9807 = vmatprep.subr.bf16.mxu0 %v12498_v18 }
 0x733   :  { %9950 = vmatpush3.bf16.msra.mxu1 %v12578_v22  ;;  %v5446_v22 = vand.u32 4294901760, %v5445_v12 }
 0x734   :  { %9951 = vmatprep.subr.bf16.mxu1 %v12498_v18 }
 0x735   :  { %9809 = vmatpush3.bf16.msra.mxu0 %v12579_v10 }
 0x736   :  { %9810 = vmatprep.subr.bf16.mxu0 %v12498_v18 }
 0x737   :  { %9953 = vmatpush3.bf16.msra.mxu1 %v12579_v10 }
 0x738   :  { %9954 = vmatprep.subr.bf16.mxu1 %v12498_v18 }
 0x739   :  { %9812 = vmatpush3.bf16.msra.mxu0 %v12580_v9 }
 0x73a   :  { %9813 = vmatprep.subr.bf16.mxu0 %v12498_v18 }
 0x73b   :  { %9956 = vmatpush3.bf16.msra.mxu1 %v12580_v9 }
 0x73c   :  { %9957 = vmatprep.subr.bf16.mxu1 %v12498_v18 }
 0x73d   :  { %9815 = vmatpush3.bf16.msra.mxu0 %v12581_v42 }
 0x73e   :  { %9816 = vmatprep.subr.bf16.mxu0 %v12498_v18 }
 0x73f   :  { %9959 = vmatpush3.bf16.msra.mxu1 %v12581_v42  ;;  %v5453_v42 = vand.u32 4294901760, %v5452_v35  ;;  %v5522_v35 = vsub.f32 %v12117_v58, %v12466_v59 }
 0x740   :  { %9960 = vmatprep.subr.bf16.mxu1 %v12498_v18 }
 0x741   :  { %9818 = vmatpush3.bf16.msra.mxu0 %v12582_v19 }
 0x742   :  { %9819 = vmatprep.subr.bf16.mxu0 %v12498_v18 }
 0x743   :  { %9962 = vmatpush3.bf16.msra.mxu1 %v12582_v19 }
 0x744   :  { %8378 = vmatmul.mubr.f32.vlgmr.msra.gmra.mrb[6].mxu0 %v11793_v46  ;;  %9963 = vmatprep.subr.bf16.mxu1 %v12498_v18 }
 0x745   :  { %9821 = vmatpush3.bf16.msra.mxu0 %v10385_v37  ;;  %8412 = vmatprep.mubr.msk.f32.mxu0 %vm10288_vm0, %v12499_v57 }
 0x746   :  { %8588 = vmatmul.mubr.f32.vlgmr.msra.gmra.mrb[8].mxu1 %v11801_v54  ;;  %9822 = vmatprep.subr.bf16.mxu0 %v12498_v18 }
 0x747   :  { %9965 = vmatpush3.bf16.msra.mxu1 %v10385_v37  ;;  %8622 = vmatprep.mubr.msk.f32.mxu1 %vm10288_vm0, %v12499_v57  ;;  %v12027_v37 = vpack.c.bf16 %v5354_v29, %v5351_v39  ;;  %v12119_v39 = vpack.c.bf16 %v5390_v50, %v5387_v40  ;;  %v12121_v29 = vsub.f32 %v5341_v63, %v5387_v40 }
 0x748   :  { %9966 = vmatprep.subr.bf16.mxu1 %v12498_v18 }
 0x749   :  { %9824 = vmatpush3.bf16.msra.mxu0 %v10394_v41 }
 0x74a   :  { %9825 = vmatprep.subr.bf16.mxu0 %v12498_v18 }
 0x74b   :  { %9968 = vmatpush3.bf16.msra.mxu1 %v10394_v41  ;;  %v5331_v41 = vld [vmem:[%s12346_s3 + $0x10] sm:$0xff] }
 0x74c   :  { %9969 = vmatprep.subr.bf16.mxu1 %v12498_v18 }
 0x74d   :  { %9827 = vmatpush3.bf16.msra.mxu0 %v10413_v49 }
 0x74e   :  { %9828 = vmatprep.subr.bf16.mxu0 %v12498_v18 }
 0x74f   :  { %9971 = vmatpush3.bf16.msra.mxu1 %v10413_v49  ;;  %v5332_v49 = vld [vmem:[%s12346_s3 + $0x18] sm:$0xff] }
 0x750   :  { %9972 = vmatprep.subr.bf16.mxu1 %v12498_v18 }
 0x751   :  { %9830 = vmatpush3.bf16.msra.mxu0 %v10453_v11 }
 0x752   :  { %9831 = vmatprep.subr.bf16.mxu0 %v12498_v18 }
 0x753   :  { %9974 = vmatpush3.bf16.msra.mxu1 %v10453_v11  ;;  %v5357_v11 = vand.u32 4294901760, %v5331_v41 }
 0x754   :  { %9975 = vmatprep.subr.bf16.mxu1 %v12498_v18 }
 0x755   :  { %9833 = vmatpush3.bf16.msra.mxu0 %v10479_v23  ;;  %v12093_v26 = vsub.f32 %v5331_v41, %v5357_v11 }
 0x756   :  { %9834 = vmatprep.subr.bf16.mxu0 %v12498_v18 }
 0x757   :  { %9977 = vmatpush3.bf16.msra.mxu1 %v10479_v23  ;;  %v5360_v23 = vand.u32 4294901760, %v5332_v49  ;;  %v5458_v10 = vand.u32 4294901760, %v12093_v26 }
 0x758   :  { %9978 = vmatprep.subr.bf16.mxu1 %v12498_v18 }
 0x759   :  { %9836 = vmatpush3.bf16.msra.mxu0 %v10517_v24  ;;  %v12095_v14 = vsub.f32 %v5332_v49, %v5360_v23  ;;  %v5459_v19 = vsub.f32 %v12093_v26, %v5458_v10  ;;  %v12151_v49 = vpack.c.bf16 %v5453_v42, %v5446_v22  ;;  %v5523_v42 = vand.u32 4294901760, %v5522_v35 }
 0x75a   :  { %9837 = vmatprep.subr.bf16.mxu0 %v12498_v18  ;;  %v10042_v35 = vpack.c.bf16 %v12099_v55, %v12097_v60  ;;  %v12588_v55 = vand.u32 4294901760, %v12117_v58 }
 0x75b   :  { %9980 = vmatpush3.bf16.msra.mxu1 %v10517_v24  ;;  %v12043_v24 = vpack.c.bf16 %v5360_v23, %v5357_v11  ;;  %v5465_v9 = vand.u32 4294901760, %v12095_v14  ;;  %v5460_v11 = vand.u32 4294901760, %v5459_v19  ;;  %v12465_v19 = vand.u32 4294901760, %v12121_v29 }
 0x75c   :  { %9981 = vmatprep.subr.bf16.mxu1 %v12498_v18 }
 0x75d   :  { %9839 = vmatpush3.bf16.msra.mxu0 %v12557_v56  ;;  %v5466_v41 = vsub.f32 %v12095_v14, %v5465_v9 }
 0x75e   :  { %9840 = vmatprep.subr.bf16.mxu0 %v12498_v18 }
 0x75f   :  { %9983 = vmatpush3.bf16.msra.mxu1 %v12557_v56  ;;  %v5372_v56 = vand.u32 4294901760, %v5336_v13  ;;  %v5467_v23 = vand.u32 4294901760, %v5466_v41  ;;  %v12464_v41 = vand.u32 4294901760, %v12123_v31 }
 0x760   :  { %9984 = vmatprep.subr.bf16.mxu1 %v12498_v18 }
 0x761   :  { %9842 = vmatpush3.bf16.msra.mxu0 %v12558_v45  ;;  %v12109_v36 = vsub.f32 %v5336_v13, %v5372_v56  ;;  %v12155_v52 = vpack.c.bf16 %v5467_v23, %v5460_v11  ;;  %v5474_v13 = vand.u32 4294901760, %v5473_v53  ;;  %v5529_v23 = vsub.f32 %v12121_v29, %v12465_v19 }
 0x762   :  { %9987 = vmatprep.subr.bf16.mxu0 %v12498_v18  ;;  %v5536_v53 = vsub.f32 %v12123_v31, %v12464_v41 }
 0x763   :  { %9986 = vmatpush3.bf16.msra.mxu1 %v12558_v45  ;;  %v12063_v45 = vpack.c.bf16 %v5372_v56, %v5369_v32  ;;  %v5481_v32 = vand.u32 4294901760, %v5480_v61  ;;  %v12471_v56 = vand.u32 4294901760, %v12107_v44  ;;  %v12470_v28 = vand.u32 4294901760, %v12109_v36 }
 0x764   :  { %8413 = vmatmul.mubr.f32.vlgmr.msra.gmra.mrb[6].mxu0 %v11793_v46  ;;  %v12073_v46 = vpack.c.bf16 %v5378_v3, %v5375_v16  ;;  %v5530_v61 = vand.u32 4294901760, %v5529_v23 }
 0x765   :  { %9989 = vmatpush3.bf16.msra.mxu0 %v12027_v37  ;;  %8657 = vmatprep.mubr.msk.f32.mxu0 %vm10288_vm0, %v12499_v57  ;;  %v12165_v5 = vpack.c.bf16 %v5481_v32, %v5474_v13  ;;  %v5487_v16 = vsub.f32 %v12107_v44, %v12471_v56  ;;  %v5494_v3 = vsub.f32 %v12109_v36, %v12470_v28  ;;  %v5537_v13 = vand.u32 4294901760, %v5536_v53 }
 0x766   :  { %8623 = vmatmul.mubr.f32.vlgmr.msra.gmra.mrb[8].mxu1 %v11801_v54  ;;  %9990 = vmatprep.subr.bf16.mxu0 %v12498_v18  ;;  %v5381_v54 = vand.u32 4294901760, %v5339_v21  ;;  %v12463_v32 = vand.u32 4294901760, %v12131_v4  ;;  %v10054_v53 = vpack.c.bf16 %v12123_v31, %v12121_v29 }
 0x767   :  { %v5495_v47 = vand.u32 4294901760, %v5494_v3  ;;  %v10030_v3 = vpack.c.bf16 %v5537_v13, %v5530_v61  ;;  %v10057_v61 = vpack.c.bf16 %v12133_v6, %v12131_v4 }
 0x768   :  { %v12083_v38 = vpack.c.bf16 %v5384_v25, %v5381_v54  ;;  %v12115_v43 = vsub.f32 %v5339_v21, %v5381_v54  ;;  %v5488_v21 = vand.u32 4294901760, %v5487_v16  ;;  %v12469_v54 = vand.u32 4294901760, %v12111_v1 }
 0x769   :  { %9992 = vmatpush3.bf16.msra.mxu0 %v12043_v24  ;;  %v12468_v25 = vand.u32 4294901760, %v12113_v17  ;;  %v12462_v16 = vand.u32 4294901760, %v12133_v6 }
 0x76a   :  { %9993 = vmatprep.subr.bf16.mxu0 %v12498_v18  ;;  %v10021_v63 = vpack.c.bf16 %v5495_v47, %v5488_v21  ;;  %v5501_v0 = vsub.f32 %v12111_v1, %v12469_v54  ;;  %v12467_v15 = vand.u32 4294901760, %v12115_v43  ;;  %v5543_v21 = vsub.f32 %v12131_v4, %v12463_v32 }
 0x76b   :  { %v5508_v40 = vsub.f32 %v12113_v17, %v12468_v25  ;;  %v5550_v47 = vsub.f32 %v12133_v6, %v12462_v16  ;;  %v10051_v23 = vpack.c.bf16 %v12117_v58, %v12115_v43  ;;  %v12587_v60 = vand.u32 4294901760, %v12115_v43 }
 0x76c   :  { %v5502_v50 = vand.u32 4294901760, %v5501_v0  ;;  %v5515_v12 = vsub.f32 %v12115_v43, %v12467_v15  ;;  %v5544_v0 = vand.u32 4294901760, %v5543_v21 }
 0x76d   :  { %9995 = vmatpush3.bf16.msra.mxu0 %v12053_v62  ;;  %v5509_v7 = vand.u32 4294901760, %v5508_v40  ;;  %v5551_v40 = vand.u32 4294901760, %v5550_v47 }
 0x76e   :  { %9996 = vmatprep.subr.bf16.mxu0 %v12498_v18  ;;  %v5516_v22 = vand.u32 4294901760, %v5515_v12  ;;  %v10039_v12 = vpack.c.bf16 %v12095_v14, %v12093_v26  ;;  %v12584_v26 = vand.u32 4294901760, %v12109_v36 }
 0x76f   :  { %v10024_v34 = vpack.c.bf16 %v5509_v7, %v5502_v50  ;;  %v10033_v50 = vpack.c.bf16 %v5551_v40, %v5544_v0  ;;  %v10036_v7 = vpack.c.bf16 %v11881_v33, %v11876_v51  ;;  %v10090_v51 = vpack.c.bf16 %v5479_v30, %v5472_v27 }
 0x770   :  { %v10027_v11 = vpack.c.bf16 %v5523_v42, %v5516_v22  ;;  %v10045_v22 = vpack.c.bf16 %v12109_v36, %v12107_v44  ;;  %v10048_v42 = vpack.c.bf16 %v12113_v17, %v12111_v1  ;;  %v12583_v33 = vand.u32 4294901760, %v12107_v44 }
 0x771   :  { %9998 = vmatpush3.bf16.msra.mxu0 %v12063_v45  ;;  %v12589_v44 = vand.u32 4294901760, %v12121_v29  ;;  %v12590_v36 = vand.u32 4294901760, %v12123_v31 }
 0x772   :  { %9999 = vmatprep.subr.bf16.mxu0 %v12498_v18  ;;  %v10093_v14 = vpack.c.bf16 %v12584_v26, %v12583_v33 }
 0x773   :  { %v10102_v27 = vpack.c.bf16 %v12590_v36, %v12589_v44 }
 0x775   :  { %10001 = vmatpush3.bf16.msra.mxu0 %v12073_v46 }
 0x776   :  { %10002 = vmatprep.subr.bf16.mxu0 %v12498_v18 }
 0x779   :  { %10004 = vmatpush3.bf16.msra.mxu0 %v12083_v38 }
 0x77a   :  { %10005 = vmatprep.subr.bf16.mxu0 %v12498_v18 }
 0x77d   :  { %10007 = vmatpush3.bf16.msra.mxu0 %v12119_v39 }
 0x77e   :  { %10008 = vmatprep.subr.bf16.mxu0 %v12498_v18 }
 0x781   :  { %10010 = vmatpush3.bf16.msra.mxu0 %v12129_v20 }
 0x782   :  { %10011 = vmatprep.subr.bf16.mxu0 %v12498_v18 }
 0x837   :  { %v4677_v13 = vpop.f32.mrb[6].mxu0 }
 0x838   :  { %v5323_v21 = vmul.f32 %v4677_v13, %v4677_v13  ;;  %v8414_v47 = vpop.f32.mrb[7].mxu0  ;;  %v5325_v41 = vsub.f32 %v11790_v8, %v4677_v13  ;;  %v10084_v8 = vpack.c.bf16 %v5451_v48, %v5444_v2  ;;  %v12585_v2 = vand.u32 4294901760, %v12111_v1 }
 0x839   :  { %v5319_v0 = vpop.f32.mrb[8].mxu1  ;;  %v12586_v48 = vand.u32 4294901760, %v12113_v17  ;;  %v12591_v1 = vand.u32 4294901760, %v12131_v4  ;;  %v12592_v17 = vand.u32 4294901760, %v12133_v6 }
 0x83a   :  { %v5324_v40 = vsub.f32 %v5319_v0, %v5323_v21  ;;  %v8624_v16 = vpop.f32.mrb[9].mxu1 }
 0x83b   :  { %v10105_v30 = vpack.c.bf16 %v12592_v17, %v12591_v1 }
 0x83c   :  { %v5326_v32 = vadd.f32 1e-05, %v5324_v40 }
 0x83e   :  { %10234 = vrsqrt.f32 %v5326_v32 }
 0x848   :  { %v10235_v19 = vpop.eup %10234 }
 0x849   :  { %v5328_v59 = vmul.f32 %v10235_v19, %v5325_v41 }
 0x84b   :  { %v12222_v15 = vand.u32 4294901760, %v5328_v59 }
 0x84d   :  { %v5432_v25 = vsub.f32 %v5328_v59, %v12222_v15 }
 0x84f   :  { %v5433_v54 = vand.u32 4294901760, %v5432_v25 }
 0x851   :  { %v5434_v28 = vsub.f32 %v5432_v25, %v5433_v54 }
 0x853   :  { %v5435_v56 = vand.u32 4294901760, %v5434_v28 }
 0x855   :  { %8658 = vmatmul.mubr.f32.vlgmr.msra.gmra.mrb[8].mxu0 %v5435_v56 }
 0x856   :  { %10013 = vmatpush3.bf16.msra.mxu0 %v12151_v49  ;;  %8692 = vmatprep.mubr.msk.f32.mxu0 %vm10288_vm0, %v12499_v57  ;;  %v10087_v49 = vpack.c.bf16 %v5465_v9, %v5458_v10  ;;  %v10096_v10 = vpack.c.bf16 %v12586_v48, %v12585_v2  ;;  %v10099_v9 = vpack.c.bf16 %v12588_v55, %v12587_v60 }
 0x857   :  { %10014 = vmatprep.subr.bf16.mxu0 %v12498_v18 }
 0x85a   :  { %10016 = vmatpush3.bf16.msra.mxu0 %v12155_v52 }
 0x85b   :  { %10017 = vmatprep.subr.bf16.mxu0 %v12498_v18 }
 0x85e   :  { %10019 = vmatpush3.bf16.msra.mxu0 %v12165_v5 }
 0x85f   :  { %10020 = vmatprep.subr.bf16.mxu0 %v12498_v18 }
 0x862   :  { %10022 = vmatpush3.bf16.msra.mxu0 %v10021_v63 }
 0x863   :  { %10023 = vmatprep.subr.bf16.mxu0 %v12498_v18 }
 0x866   :  { %10025 = vmatpush3.bf16.msra.mxu0 %v10024_v34 }
 0x867   :  { %10026 = vmatprep.subr.bf16.mxu0 %v12498_v18 }
 0x86a   :  { %10028 = vmatpush3.bf16.msra.mxu0 %v10027_v11 }
 0x86b   :  { %10029 = vmatprep.subr.bf16.mxu0 %v12498_v18 }
 0x86e   :  { %10031 = vmatpush3.bf16.msra.mxu0 %v10030_v3 }
 0x86f   :  { %10032 = vmatprep.subr.bf16.mxu0 %v12498_v18 }
 0x872   :  { %10034 = vmatpush3.bf16.msra.mxu0 %v10033_v50 }
 0x873   :  { %10035 = vmatprep.subr.bf16.mxu0 %v12498_v18 }
 0x875   :  { %8693 = vmatmul.mubr.f32.vlgmr.msra.gmra.mrb[8].mxu0 %v12222_v15 }
 0x876   :  { %10037 = vmatpush3.bf16.msra.mxu0 %v10036_v7  ;;  %8727 = vmatprep.mubr.msk.f32.mxu0 %vm10288_vm0, %v12499_v57 }
 0x877   :  { %10038 = vmatprep.subr.bf16.mxu0 %v12498_v18 }
 0x87a   :  { %10040 = vmatpush3.bf16.msra.mxu0 %v10039_v12 }
 0x87b   :  { %10041 = vmatprep.subr.bf16.mxu0 %v12498_v18 }
 0x87e   :  { %10043 = vmatpush3.bf16.msra.mxu0 %v10042_v35 }
 0x87f   :  { %10044 = vmatprep.subr.bf16.mxu0 %v12498_v18 }
 0x882   :  { %10046 = vmatpush3.bf16.msra.mxu0 %v10045_v22 }
 0x883   :  { %10047 = vmatprep.subr.bf16.mxu0 %v12498_v18 }
 0x886   :  { %10049 = vmatpush3.bf16.msra.mxu0 %v10048_v42 }
 0x887   :  { %10050 = vmatprep.subr.bf16.mxu0 %v12498_v18 }
 0x88a   :  { %10052 = vmatpush3.bf16.msra.mxu0 %v10051_v23 }
 0x88b   :  { %10053 = vmatprep.subr.bf16.mxu0 %v12498_v18 }
 0x88e   :  { %10055 = vmatpush3.bf16.msra.mxu0 %v10054_v53 }
 0x88f   :  { %10056 = vmatprep.subr.bf16.mxu0 %v12498_v18 }
 0x892   :  { %10058 = vmatpush3.bf16.msra.mxu0 %v10057_v61 }
 0x893   :  { %10059 = vmatprep.subr.bf16.mxu0 %v12498_v18 }
 0x895   :  { %8728 = vmatmul.mubr.f32.vlgmr.msra.gmra.mrb[8].mxu0 %v5432_v25 }
 0x896   :  { %10061 = vmatpush3.bf16.msra.mxu0 %v12027_v37  ;;  %8762 = vmatprep.mubr.msk.f32.mxu0 %vm10288_vm0, %v12499_v57 }
 0x897   :  { %10062 = vmatprep.subr.bf16.mxu0 %v12498_v18 }
 0x89a   :  { %10064 = vmatpush3.bf16.msra.mxu0 %v12043_v24 }
 0x89b   :  { %10065 = vmatprep.subr.bf16.mxu0 %v12498_v18 }
 0x89e   :  { %10067 = vmatpush3.bf16.msra.mxu0 %v12053_v62 }
 0x89f   :  { %10068 = vmatprep.subr.bf16.mxu0 %v12498_v18 }
 0x8a2   :  { %10070 = vmatpush3.bf16.msra.mxu0 %v12063_v45 }
 0x8a3   :  { %10071 = vmatprep.subr.bf16.mxu0 %v12498_v18 }
 0x8a6   :  { %10073 = vmatpush3.bf16.msra.mxu0 %v12073_v46 }
 0x8a7   :  { %10074 = vmatprep.subr.bf16.mxu0 %v12498_v18 }
 0x8aa   :  { %10076 = vmatpush3.bf16.msra.mxu0 %v12083_v38 }
 0x8ab   :  { %10077 = vmatprep.subr.bf16.mxu0 %v12498_v18 }
 0x8ae   :  { %10079 = vmatpush3.bf16.msra.mxu0 %v12119_v39 }
 0x8af   :  { %10080 = vmatprep.subr.bf16.mxu0 %v12498_v18 }
 0x8b2   :  { %10082 = vmatpush3.bf16.msra.mxu0 %v12129_v20 }
 0x8b3   :  { %10083 = vmatprep.subr.bf16.mxu0 %v12498_v18 }
 0x8b5   :  { %8763 = vmatmul.mubr.f32.vlgmr.msra.gmra.mrb[8].mxu0 %v5433_v54 }
 0x8b6   :  { %10085 = vmatpush3.bf16.msra.mxu0 %v10084_v8  ;;  %8797 = vmatprep.mubr.msk.f32.mxu0 %vm10288_vm0, %v12499_v57 }
 0x8b7   :  { %10086 = vmatprep.subr.bf16.mxu0 %v12498_v18 }
 0x8ba   :  { %10088 = vmatpush3.bf16.msra.mxu0 %v10087_v49 }
 0x8bb   :  { %10089 = vmatprep.subr.bf16.mxu0 %v12498_v18 }
 0x8be   :  { %10091 = vmatpush3.bf16.msra.mxu0 %v10090_v51 }
 0x8bf   :  { %10092 = vmatprep.subr.bf16.mxu0 %v12498_v18 }
 0x8c2   :  { %10094 = vmatpush3.bf16.msra.mxu0 %v10093_v14 }
 0x8c3   :  { %10095 = vmatprep.subr.bf16.mxu0 %v12498_v18 }
 0x8c6   :  { %10097 = vmatpush3.bf16.msra.mxu0 %v10096_v10 }
 0x8c7   :  { %10098 = vmatprep.subr.bf16.mxu0 %v12498_v18 }
 0x8ca   :  { %10100 = vmatpush3.bf16.msra.mxu0 %v10099_v9 }
 0x8cb   :  { %10101 = vmatprep.subr.bf16.mxu0 %v12498_v18 }
 0x8ce   :  { %10103 = vmatpush3.bf16.msra.mxu0 %v10102_v27 }
 0x8cf   :  { %10104 = vmatprep.subr.bf16.mxu0 %v12498_v18 }
 0x8d2   :  { %10106 = vmatpush3.bf16.msra.mxu0 %v10105_v30 }
 0x8d3   :  { %10107 = vmatprep.subr.bf16.mxu0 %v12498_v18 }
 0x8d5   :  { %8798 = vmatmul.mubr.f32.vlgmr.msra.gmra.mrb[8].mxu0 %v12222_v15 }
 0x8d6   :  { %10109 = vmatpush3.bf16.msra.mxu0 %v12027_v37  ;;  %8832 = vmatprep.mubr.msk.f32.mxu0 %vm10288_vm0, %v12499_v57  ;;  %v6026_v57 = vld [vmem:[%s12347_s4 + $0x2] ss:$0 sm:$0xff]  ;;  %vm5991_vm0 = vcmask 25600  }
 0x8d7   :  { %10110 = vmatprep.subr.bf16.mxu0 %v12498_v18 }
 0x8da   :  { %10112 = vmatpush3.bf16.msra.mxu0 %v12043_v24 }
 0x8db   :  { %10113 = vmatprep.subr.bf16.mxu0 %v12498_v18 }
 0x8de   :  { %10115 = vmatpush3.bf16.msra.mxu0 %v12053_v62 }
 0x8df   :  { %10116 = vmatprep.subr.bf16.mxu0 %v12498_v18 }
 0x8e2   :  { %10118 = vmatpush3.bf16.msra.mxu0 %v12063_v45 }
 0x8e3   :  { %10119 = vmatprep.subr.bf16.mxu0 %v12498_v18 }
 0x8e6   :  { %10121 = vmatpush3.bf16.msra.mxu0 %v12073_v46 }
 0x8e7   :  { %10122 = vmatprep.subr.bf16.mxu0 %v12498_v18 }
 0x8ea   :  { %10124 = vmatpush3.bf16.msra.mxu0 %v12083_v38 }
 0x8eb   :  { %10125 = vmatprep.subr.bf16.mxu0 %v12498_v18 }
 0x8ee   :  { %10127 = vmatpush3.bf16.msra.mxu0 %v12119_v39 }
 0x8ef   :  { %10128 = vmatprep.subr.bf16.mxu0 %v12498_v18 }
 0x8f2   :  { %10130 = vmatpush3.bf16.msra.mxu0 %v12129_v20 }
 0x8f5   :  { %8833 = vmatmul.mubr.f32.vlgmr.msra.gmra.mrb[8].mxu0 %v12222_v15 }
 0x9c8   :  { %v5987_v37 = vpop.f32.mrb[8].mxu0 }
 0x9c9   :  { %v10134_v24 = vadd.f32 %v6026_v57, %v5987_v37  ;;  %v8834_v62 = vpop.f32.mrb[9].mxu0 }
 0x9cb   :  { %5992 = vst.msk [vmem:[#allocation5] sm:$0x3] %vm5991_vm0, %v10134_v24 }
 0x9cc   :  { %10269 = shalt.err (!%p10266_p12)
}
 0x9cd   :  { %s10270_s25 = scalar_lea.hbm %s12348_s5, 32 }
 0x9ce   :  { %p10271_p13 = scmp.ne.s32.totalorder %s12348_s5, %s10270_s25  ;;  %p10274_p0 = scmp.lt.u32.totalorder %s10270_s25, %s12348_s5 }
 0x9d0   :  { %p10276_p1 = pnand %p10274_p0, %p10271_p13 }
 0x9d2   :  { %10279 = shalt.err (!%p10276_p1)
}
 0x9d3   :  { %6002 = dma.vmem_to_hbm [thread:$0]  %s6000_s21, 32, %s12348_s5, [#allocation4]  }
 0x9d4   :  { %10282 = dma.done.wait [#allocation4], 32  }
 0x9d5   :  { %10283 = vsyncadd [#allocation4], 4294967264 }
 0x9d6   :  { %6006 = vsyncpa [#allocation3], 1 }
 0x9d7   :  { %6007 = vsyncpa [#allocation4], 1 }

</bundles_post_ra>
